<compile_context>
chip_gen: v5e
topology: v5e:2x2
jax: 0.10.0
libtpu: 0.0.40
codegen_flags: <defaults>
</compile_context>

<pallas_src>
import functools

import numpy as np
import jax
import jax.numpy as jnp
from jax import lax
from jax.experimental import pallas as pl
from jax.experimental.pallas import tpu as pltpu

KH = KW = 5
C_IN, C1, C2 = 3, 6, 9
H_IN = W_IN = 28
H1 = W1 = H_IN - KH + 1        # 24  conv1 output
P1 = H1 // 2                   # 12  pool1 output
H2 = W2 = P1 - KH + 1          # 8   conv2 output
P2 = H2 // 2                   # 4   pool2 output
Q2 = P2 * P2                   # 16  features per channel after pool2
FC_IN = C2 * Q2                # 144


# ----------------------------------------------------------------------------
# Constant / input preparation (plain JAX / numpy, done once or tiny)
# ----------------------------------------------------------------------------
def _build_conv1_patches(x):
    """im2col for conv1 with pool-major column ordering.

    Returns [C_IN*KH*KW, 4*B*144] where
      row    = ci*25 + ki*5 + kj           (matches W1.reshape(6, 75))
      column = dv*(2*B*144) + dh*(B*144) + b*144 + ph*12 + pw
    and the conv1 output pixel for that column is (2*ph+dv, 2*pw+dh).
    """
    b = x.shape[0]
    taps = []
    for ki in range(KH):
        for kj in range(KW):
            taps.append(x[:, :, ki:ki + H1, kj:kj + W1])     # [B, 3, 24, 24]
    p = jnp.stack(taps, axis=2)                              # [B, 3, 25, 24, 24]
    p = p.reshape(b, C_IN, KH * KW, P1, 2, P1, 2)            # oh=(ph,dv), ow=(pw,dh)
    p = p.transpose(1, 2, 4, 6, 0, 3, 5)                     # [ci, tap, dv, dh, b, ph, pw]
    return p.reshape(C_IN * KH * KW, 4 * b * P1 * P1)


def _build_conv2_select(batch):
    """0/1 gather matrix for conv2: maps the shifted pool1 window accumulator
    onto the valid 8x8 conv2 pixels, columns grouped in four contiguous
    [batch*16]-wide blocks, one per 2x2 pool offset (dv, dh):
      dst = ((2*dv+dh)*batch + b)*16 + qh*4 + qw
      src = b*144 + (2*qh+dv)*12 + (2*qw+dh)
    """
    n_src = batch * P1 * P1 - (KH - 1) * P1 - (KW - 1)   # 236 for batch=2
    n_dst = 4 * batch * Q2                               # 128 for batch=2
    s = np.zeros((n_src, n_dst), np.float32)
    for dv in range(2):
        for dh in range(2):
            for b in range(batch):
                for qh in range(P2):
                    for qw in range(P2):
                        dst = ((2 * dv + dh) * batch + b) * Q2 + qh * P2 + qw
                        src = b * (P1 * P1) + (2 * qh + dv) * P1 + (2 * qw + dh)
                        s[src, dst] = 1.0
    return s


def _slab_layout(batch):
    """Row offsets of every constant inside the single packed slab.

    Each band starts at a multiple-of-8 row; returns (offsets, rows, width)
    where offsets[name] = (row, height, width_used).
    """
    lsel = batch * P1 * P1 - (KH - 1) * P1 - (KW - 1)
    entries = [
        ("w1",   C1, C_IN * KH * KW + 1),        # conv1 weights + bias column
        ("w2",   C2, C1 * KH * KW + 1),          # conv2 weights + bias column
        ("sel",  lsel, 4 * batch * Q2),          # conv2 gather/pool selector
        ("pc",   C2, FC_IN),                     # channel-spread matrix
        ("mask", batch * Q2, FC_IN),             # pool-position mask
        ("rsum", batch, batch * Q2),             # batch-block reducer
        ("fc1",  FC_IN + 1, 72),                 # fc weights + bias row
        ("fc2",  72 + 1, 48),
        ("fc3",  48 + 1, 12),
        ("out",  12 + 1, 3),
    ]
    off = {}
    r = 0
    width = 0
    for name, h, w in entries:
        off[name] = (r, h, w)
        r += ((h + 7) // 8) * 8
        width = max(width, w)
    width = ((width + 7) // 8) * 8
    return off, r, width


def prepare_constants(params, batch):
    """One-time packing of every parameter / constant into a single slab."""
    off, rows, width = _slab_layout(batch)
    slab = np.zeros((rows, width), np.float32)

    def put(name, arr):
        arr = np.asarray(arr, np.float32)
        r, h, w = off[name]
        assert arr.shape == (h, w), (name, arr.shape, (h, w))
        slab[r:r + h, :w] = arr

    w1g = np.asarray(params["w_conv1"], np.float32).reshape(C1, C_IN * KH * KW)
    b1 = np.asarray(params["b_conv1"], np.float32).reshape(C1, 1)
    put("w1", np.concatenate([w1g, b1], axis=1))

    # conv2 weights with columns ordered (tap, ci): contiguous [9, 6] per tap
    w2t = np.transpose(np.asarray(params["w_conv2"], np.float32),
                       (0, 2, 3, 1)).reshape(C2, KH * KW * C1)
    b2 = np.asarray(params["b_conv2"], np.float32).reshape(C2, 1)
    put("w2", np.concatenate([w2t, b2], axis=1))

    put("sel", _build_conv2_select(batch))
    # flatten helpers: pc spreads channel c onto feature columns c*16..c*16+15,
    # mask keeps only the matching pool position q, rsum sums each batch block.
    put("pc", np.kron(np.eye(C2, dtype=np.float32), np.ones((1, Q2), np.float32)))
    put("mask", np.tile(np.tile(np.eye(Q2, dtype=np.float32), (1, C2)), (batch, 1)))
    put("rsum", np.kron(np.eye(batch, dtype=np.float32), np.ones((1, Q2), np.float32)))

    for name, wk, bk in (("fc1", "w_fc1", "b_fc1"), ("fc2", "w_fc2", "b_fc2"),
                         ("fc3", "w_fc3", "b_fc3"), ("out", "w_out", "b_out")):
        w = np.asarray(params[wk], np.float32)
        b = np.asarray(params[bk], np.float32).reshape(1, -1)
        put(name, np.concatenate([w, b], axis=0))

    return {"slab": jnp.asarray(slab)}


# ----------------------------------------------------------------------------
# The fused Pallas kernel (single invocation, everything in VMEM)
# ----------------------------------------------------------------------------
def _network_kernel(patches_ref, slab_ref, out_ref, p1_ref, *, batch, off):
    np1 = batch * P1 * P1                       # 288  pool1 columns
    np2 = batch * Q2                            # 32   pool2 columns
    lsel = np1 - (KH - 1) * P1 - (KW - 1)       # 236  conv2 accumulator width
    n_w1 = C_IN * KH * KW                       # 75
    n_w2 = C1 * KH * KW                         # 150

    r_w1 = off["w1"][0]
    r_w2 = off["w2"][0]
    r_sel, h_sel, w_sel = off["sel"]
    r_pc, h_pc, w_pc = off["pc"]
    r_mk, h_mk, w_mk = off["mask"]
    r_rs, h_rs, w_rs = off["rsum"]

    # ---- conv1 (+bias, ReLU) and 2x2 max-pool --------------------------------
    # ONE lane-dense GEMM over all four pool-offset column groups; the pool is
    # a max over rolled copies (direction-agnostic, so any roll convention is
    # correct), then bias + ReLU once on the pooled result.
    w1 = slab_ref[pl.ds(r_w1, C1), pl.ds(0, n_w1)]                          # [6, 75]
    b1 = slab_ref[pl.ds(r_w1, C1), pl.ds(n_w1, 1)]                          # [6, 1]
    y1 = jnp.dot(w1, patches_ref[...], preferred_element_type=jnp.float32)  # [6, 4*np1]
    m1 = jnp.maximum(
        jnp.maximum(y1, pltpu.roll(y1, np1, axis=1)),
        jnp.maximum(pltpu.roll(y1, 2 * np1, axis=1),
                    pltpu.roll(y1, 3 * np1, axis=1)))
    p1_ref[...] = jnp.maximum(m1[:, 0:np1] + b1, 0.0)                       # [6, 288]

    # ---- conv2: accumulate W2_tap @ shifted(pool1) over the 25 taps ----------
    # The shifted windows are unaligned reads from a small read-only-after-
    # write VMEM scratch (proven lowering path); everything else stays in vregs.
    b2 = slab_ref[pl.ds(r_w2, C2), pl.ds(n_w2, 1)]                          # [9, 1]
    acc = None
    for ki in range(KH):
        for kj in range(KW):
            t = ki * KW + kj
            w2_t = slab_ref[pl.ds(r_w2, C2), pl.ds(t * C1, C1)]             # [9, 6]
            win = p1_ref[:, pl.ds(ki * P1 + kj, lsel)]                      # [6, 236]
            d = jnp.dot(w2_t, win, preferred_element_type=jnp.float32)
            acc = d if acc is None else acc + d                             # [9, 236]

    # ---- ONE select GEMM, 2x2 pool via rolled maxes, bias + ReLU -------------
    selm = slab_ref[pl.ds(r_sel, h_sel), pl.ds(0, w_sel)]                   # [236, 128]
    y2 = jnp.dot(acc, selm, preferred_element_type=jnp.float32)             # [9, 128]
    m2 = jnp.maximum(
        jnp.maximum(y2, pltpu.roll(y2, np2, axis=1)),
        jnp.maximum(pltpu.roll(y2, 2 * np2, axis=1),
                    pltpu.roll(y2, 3 * np2, axis=1)))
    pooled2 = jnp.maximum(m2[:, 0:np2] + b2, 0.0)                           # [9, 32]

    # ---- flatten to PyTorch channel-major order, entirely as value math ------
    # spread channels over the 144-wide feature axis, keep only the matching
    # pool position, reduce each batch block: xfc[b, c*16+q] = pooled2[c, b*16+q]
    pc = slab_ref[pl.ds(r_pc, h_pc), pl.ds(0, w_pc)]                        # [9, 144]
    msk = slab_ref[pl.ds(r_mk, h_mk), pl.ds(0, w_mk)]                       # [32, 144]
    rsum = slab_ref[pl.ds(r_rs, h_rs), pl.ds(0, w_rs)]                      # [B, 32]
    zc = jnp.dot(pooled2.T, pc, preferred_element_type=jnp.float32)         # [32, 144]
    xfc = jnp.dot(rsum, zc * msk, preferred_element_type=jnp.float32)       # [B, 144]

    # ---- fully connected stack ------------------------------------------------
    def fc(h, name, relu):
        r, hh, ww = off[name]
        w = slab_ref[pl.ds(r, hh - 1), pl.ds(0, ww)]
        b = slab_ref[pl.ds(r + hh - 1, 1), pl.ds(0, ww)]
        y = jnp.dot(h, w, preferred_element_type=jnp.float32) + b
        return jnp.maximum(y, 0.0) if relu else y

    h = fc(xfc, "fc1", True)
    h = fc(h, "fc2", True)
    h = fc(h, "fc3", True)
    out_ref[...] = fc(h, "out", False)


def network_forward(consts, x):
    batch = x.shape[0]
    patches = _build_conv1_patches(x)          # plain-JAX prep of the raw input (same jit)
    off, _, _ = _slab_layout(batch)
    np1 = batch * P1 * P1
    vmem = pl.BlockSpec(memory_space=pltpu.MemorySpace.VMEM)
    return pl.pallas_call(
        functools.partial(_network_kernel, batch=batch, off=off),
        out_shape=jax.ShapeDtypeStruct((batch, 3), jnp.float32),
        in_specs=[vmem, vmem],
        out_specs=vmem,
        scratch_shapes=[pltpu.VMEM((C1, np1), jnp.float32)],   # pool1 activations
    )(patches, consts["slab"])


# ----------------------------------------------------------------------------
# Deterministic parameter init (PyTorch-style uniform(-1/sqrt(fan_in), ...))
# ----------------------------------------------------------------------------
def _uniform(key, shape, fan_in):
    bound = 1.0 / jnp.sqrt(jnp.float32(fan_in))
    return jax.random.uniform(key, shape, jnp.float32, -bound, bound)


def init_params(key):
    ks = jax.random.split(key, 12)
    p = {}
    p["w_conv1"] = _uniform(ks[0], (C1, C_IN, KH, KW), C_IN * KH * KW)
    p["b_conv1"] = _uniform(ks[1], (C1,), C_IN * KH * KW)
    p["w_conv2"] = _uniform(ks[2], (C2, C1, KH, KW), C1 * KH * KW)
    p["b_conv2"] = _uniform(ks[3], (C2,), C1 * KH * KW)
    # Linear weights stored as [in, out] (i.e. already transposed for x @ W).
    p["w_fc1"] = _uniform(ks[4], (FC_IN, 72), FC_IN)
    p["b_fc1"] = _uniform(ks[5], (72,), FC_IN)
    p["w_fc2"] = _uniform(ks[6], (72, 48), 72)
    p["b_fc2"] = _uniform(ks[7], (48,), 72)
    p["w_fc3"] = _uniform(ks[8], (48, 12), 48)
    p["b_fc3"] = _uniform(ks[9], (12,), 48)
    p["w_out"] = _uniform(ks[10], (12, 3), 12)
    p["b_out"] = _uniform(ks[11], (3,), 12)
    return p


# ----------------------------------------------------------------------------
# Pure-JAX reference (numerical sanity check only)
# ----------------------------------------------------------------------------
def _reference_forward(params, x):
    dn = ("NCHW", "OIHW", "NCHW")
    t = lax.conv_general_dilated(x, params["w_conv1"], (1, 1), "VALID",
                                 dimension_numbers=dn)
    t = jax.nn.relu(t + params["b_conv1"][None, :, None, None])
    t = lax.reduce_window(t, -jnp.inf, lax.max, (1, 1, 2, 2), (1, 1, 2, 2), "VALID")
    t = lax.conv_general_dilated(t, params["w_conv2"], (1, 1), "VALID",
                                 dimension_numbers=dn)
    t = jax.nn.relu(t + params["b_conv2"][None, :, None, None])
    t = lax.reduce_window(t, -jnp.inf, lax.max, (1, 1, 2, 2), (1, 1, 2, 2), "VALID")
    t = t.reshape(-1, FC_IN)
    t = jax.nn.relu(t @ params["w_fc1"] + params["b_fc1"])
    t = jax.nn.relu(t @ params["w_fc2"] + params["b_fc2"])
    t = jax.nn.relu(t @ params["w_fc3"] + params["b_fc3"])
    return t @ params["w_out"] + params["b_out"]


if __name__ == "__main__":
    key = jax.random.PRNGKey(0)
    k_params, k_input = jax.random.split(key)
    params = init_params(k_params)
    # Input spatial size must be 28x28 so the flatten hits 9*4*4.
    x = jax.random.normal(k_input, (2, 3, 28, 28), dtype=jnp.float32)

    consts = prepare_constants(params, batch=x.shape[0])
    fwd = jax.jit(network_forward)
    out = jax.block_until_ready(fwd(consts, x))
    assert out.shape == (2, 3) and out.dtype == jnp.float32

    ref = jax.block_until_ready(_reference_forward(params, x))
    assert jnp.allclose(out, ref, atol=1e-3, rtol=1e-3), (out, ref)
    print("KERNEL_OK")
</pallas_src>

<mosaic_0001>
module attributes {stable_mosaic.version = 11 : i64} {
  func.func @_network_kernel(%arg0: memref<75x1152xf32, #tpu.memory_space<vmem>>, %arg1: memref<624x152xf32, #tpu.memory_space<vmem>>, %arg2: memref<2x3xf32, #tpu.memory_space<vmem>>, %arg3: memref<6x288xf32, #tpu.memory_space<vmem>>) attributes {dimension_semantics = [], scalar_prefetch = 0 : i64, scratch_operands = 1 : i64, tpu.core_type = #tpu.core_type<tc>} {
    %c0 = arith.constant 0 : index
    %c0_0 = arith.constant 0 : index
    %0 = vector.load %arg1[%c0, %c0_0] : memref<624x152xf32, #tpu.memory_space<vmem>>, vector<6x75xf32>
    %c0_1 = arith.constant 0 : index
    %c75 = arith.constant 75 : index
    %1 = vector.load %arg1[%c0_1, %c75] : memref<624x152xf32, #tpu.memory_space<vmem>>, vector<6x1xf32>
    %c0_2 = arith.constant 0 : index
    %c0_3 = arith.constant 0 : index
    %2 = vector.load %arg0[%c0_2, %c0_3] : memref<75x1152xf32, #tpu.memory_space<vmem>>, vector<75x1152xf32>
    %cst = arith.constant dense<0.000000e+00> : vector<6x1152xf32>
    %3 = tpu.matmul %0, %2, %cst {dimension_numbers = #tpu.dot_dimension_numbers<[1], [0], [0], [1], [0, 0, 1, 1], [], []>} : vector<6x75xf32>, vector<75x1152xf32>, vector<6x1152xf32> -> vector<6x1152xf32>
    %c288_i32 = arith.constant 288 : i32
    %4 = tpu.dynamic_rotate %3 by %c288_i32 dim 1 : vector<6x1152xf32>, i32 -> vector<6x1152xf32>
    %5 = arith.maximumf %3, %4 : vector<6x1152xf32>
    %c576_i32 = arith.constant 576 : i32
    %6 = tpu.dynamic_rotate %3 by %c576_i32 dim 1 : vector<6x1152xf32>, i32 -> vector<6x1152xf32>
    %c864_i32 = arith.constant 864 : i32
    %7 = tpu.dynamic_rotate %3 by %c864_i32 dim 1 : vector<6x1152xf32>, i32 -> vector<6x1152xf32>
    %8 = arith.maximumf %6, %7 : vector<6x1152xf32>
    %9 = arith.maximumf %5, %8 : vector<6x1152xf32>
    %10 = vector.extract_strided_slice %9 {offsets = [0, 0], sizes = [6, 288], strides = [1, 1]} : vector<6x1152xf32> to vector<6x288xf32>
    %11 = vector.broadcast %1 : vector<6x1xf32> to vector<6x288xf32>
    %12 = arith.addf %10, %11 : vector<6x288xf32>
    %cst_4 = arith.constant 0.000000e+00 : f32
    %13 = vector.broadcast %cst_4 : f32 to vector<6x288xf32>
    %14 = arith.maximumf %12, %13 : vector<6x288xf32>
    %c0_5 = arith.constant 0 : index
    %c0_6 = arith.constant 0 : index
    %15 = vector.load %arg3[%c0_5, %c0_6] : memref<6x288xf32, #tpu.memory_space<vmem>>, vector<6x288xf32>
    tpu.vector_store %arg3[%c0_5, %c0_6], %14 {strides = array<i32>} : memref<6x288xf32, #tpu.memory_space<vmem>>, vector<6x288xf32>,
    %c8 = arith.constant 8 : index
    %c150 = arith.constant 150 : index
    %16 = vector.load %arg1[%c8, %c150] : memref<624x152xf32, #tpu.memory_space<vmem>>, vector<9x1xf32>
    %c8_7 = arith.constant 8 : index
    %c0_8 = arith.constant 0 : index
    %17 = vector.load %arg1[%c8_7, %c0_8] : memref<624x152xf32, #tpu.memory_space<vmem>>, vector<9x6xf32>
    %c0_9 = arith.constant 0 : index
    %c0_10 = arith.constant 0 : index
    %18 = vector.load %arg3[%c0_9, %c0_10] : memref<6x288xf32, #tpu.memory_space<vmem>>, vector<6x236xf32>
    %cst_11 = arith.constant dense<0.000000e+00> : vector<9x236xf32>
    %19 = tpu.matmul %17, %18, %cst_11 {dimension_numbers = #tpu.dot_dimension_numbers<[1], [0], [0], [1], [0, 0, 1, 1], [], []>} : vector<9x6xf32>, vector<6x236xf32>, vector<9x236xf32> -> vector<9x236xf32>
    %c8_12 = arith.constant 8 : index
    %c6 = arith.constant 6 : index
    %20 = vector.load %arg1[%c8_12, %c6] : memref<624x152xf32, #tpu.memory_space<vmem>>, vector<9x6xf32>
    %c0_13 = arith.constant 0 : index
    %c1 = arith.constant 1 : index
    %21 = vector.load %arg3[%c0_13, %c1] : memref<6x288xf32, #tpu.memory_space<vmem>>, vector<6x236xf32>
    %cst_14 = arith.constant dense<0.000000e+00> : vector<9x236xf32>
    %22 = tpu.matmul %20, %21, %cst_14 {dimension_numbers = #tpu.dot_dimension_numbers<[1], [0], [0], [1], [0, 0, 1, 1], [], []>} : vector<9x6xf32>, vector<6x236xf32>, vector<9x236xf32> -> vector<9x236xf32>
    %23 = arith.addf %19, %22 : vector<9x236xf32>
    %c8_15 = arith.constant 8 : index
    %c12 = arith.constant 12 : index
    %24 = vector.load %arg1[%c8_15, %c12] : memref<624x152xf32, #tpu.memory_space<vmem>>, vector<9x6xf32>
    %c0_16 = arith.constant 0 : index
    %c2 = arith.constant 2 : index
    %25 = vector.load %arg3[%c0_16, %c2] : memref<6x288xf32, #tpu.memory_space<vmem>>, vector<6x236xf32>
    %cst_17 = arith.constant dense<0.000000e+00> : vector<9x236xf32>
    %26 = tpu.matmul %24, %25, %cst_17 {dimension_numbers = #tpu.dot_dimension_numbers<[1], [0], [0], [1], [0, 0, 1, 1], [], []>} : vector<9x6xf32>, vector<6x236xf32>, vector<9x236xf32> -> vector<9x236xf32>
    %27 = arith.addf %23, %26 : vector<9x236xf32>
    %c8_18 = arith.constant 8 : index
    %c18 = arith.constant 18 : index
    %28 = vector.load %arg1[%c8_18, %c18] : memref<624x152xf32, #tpu.memory_space<vmem>>, vector<9x6xf32>
    %c0_19 = arith.constant 0 : index
    %c3 = arith.constant 3 : index
    %29 = vector.load %arg3[%c0_19, %c3] : memref<6x288xf32, #tpu.memory_space<vmem>>, vector<6x236xf32>
    %cst_20 = arith.constant dense<0.000000e+00> : vector<9x236xf32>
    %30 = tpu.matmul %28, %29, %cst_20 {dimension_numbers = #tpu.dot_dimension_numbers<[1], [0], [0], [1], [0, 0, 1, 1], [], []>} : vector<9x6xf32>, vector<6x236xf32>, vector<9x236xf32> -> vector<9x236xf32>
    %31 = arith.addf %27, %30 : vector<9x236xf32>
    %c8_21 = arith.constant 8 : index
    %c24 = arith.constant 24 : index
    %32 = vector.load %arg1[%c8_21, %c24] : memref<624x152xf32, #tpu.memory_space<vmem>>, vector<9x6xf32>
    %c0_22 = arith.constant 0 : index
    %c4 = arith.constant 4 : index
    %33 = vector.load %arg3[%c0_22, %c4] : memref<6x288xf32, #tpu.memory_space<vmem>>, vector<6x236xf32>
    %cst_23 = arith.constant dense<0.000000e+00> : vector<9x236xf32>
    %34 = tpu.matmul %32, %33, %cst_23 {dimension_numbers = #tpu.dot_dimension_numbers<[1], [0], [0], [1], [0, 0, 1, 1], [], []>} : vector<9x6xf32>, vector<6x236xf32>, vector<9x236xf32> -> vector<9x236xf32>
    %35 = arith.addf %31, %34 : vector<9x236xf32>
    %c8_24 = arith.constant 8 : index
    %c30 = arith.constant 30 : index
    %36 = vector.load %arg1[%c8_24, %c30] : memref<624x152xf32, #tpu.memory_space<vmem>>, vector<9x6xf32>
    %c0_25 = arith.constant 0 : index
    %c12_26 = arith.constant 12 : index
    %37 = vector.load %arg3[%c0_25, %c12_26] : memref<6x288xf32, #tpu.memory_space<vmem>>, vector<6x236xf32>
    %cst_27 = arith.constant dense<0.000000e+00> : vector<9x236xf32>
    %38 = tpu.matmul %36, %37, %cst_27 {dimension_numbers = #tpu.dot_dimension_numbers<[1], [0], [0], [1], [0, 0, 1, 1], [], []>} : vector<9x6xf32>, vector<6x236xf32>, vector<9x236xf32> -> vector<9x236xf32>
    %39 = arith.addf %35, %38 : vector<9x236xf32>
    %c8_28 = arith.constant 8 : index
    %c36 = arith.constant 36 : index
    %40 = vector.load %arg1[%c8_28, %c36] : memref<624x152xf32, #tpu.memory_space<vmem>>, vector<9x6xf32>
    %c0_29 = arith.constant 0 : index
    %c13 = arith.constant 13 : index
    %41 = vector.load %arg3[%c0_29, %c13] : memref<6x288xf32, #tpu.memory_space<vmem>>, vector<6x236xf32>
    %cst_30 = arith.constant dense<0.000000e+00> : vector<9x236xf32>
    %42 = tpu.matmul %40, %41, %cst_30 {dimension_numbers = #tpu.dot_dimension_numbers<[1], [0], [0], [1], [0, 0, 1, 1], [], []>} : vector<9x6xf32>, vector<6x236xf32>, vector<9x236xf32> -> vector<9x236xf32>
    %43 = arith.addf %39, %42 : vector<9x236xf32>
    %c8_31 = arith.constant 8 : index
    %c42 = arith.constant 42 : index
    %44 = vector.load %arg1[%c8_31, %c42] : memref<624x152xf32, #tpu.memory_space<vmem>>, vector<9x6xf32>
    %c0_32 = arith.constant 0 : index
    %c14 = arith.constant 14 : index
    %45 = vector.load %arg3[%c0_32, %c14] : memref<6x288xf32, #tpu.memory_space<vmem>>, vector<6x236xf32>
    %cst_33 = arith.constant dense<0.000000e+00> : vector<9x236xf32>
    %46 = tpu.matmul %44, %45, %cst_33 {dimension_numbers = #tpu.dot_dimension_numbers<[1], [0], [0], [1], [0, 0, 1, 1], [], []>} : vector<9x6xf32>, vector<6x236xf32>, vector<9x236xf32> -> vector<9x236xf32>
    %47 = arith.addf %43, %46 : vector<9x236xf32>
    %c8_34 = arith.constant 8 : index
    %c48 = arith.constant 48 : index
    %48 = vector.load %arg1[%c8_34, %c48] : memref<624x152xf32, #tpu.memory_space<vmem>>, vector<9x6xf32>
    %c0_35 = arith.constant 0 : index
    %c15 = arith.constant 15 : index
    %49 = vector.load %arg3[%c0_35, %c15] : memref<6x288xf32, #tpu.memory_space<vmem>>, vector<6x236xf32>
    %cst_36 = arith.constant dense<0.000000e+00> : vector<9x236xf32>
    %50 = tpu.matmul %48, %49, %cst_36 {dimension_numbers = #tpu.dot_dimension_numbers<[1], [0], [0], [1], [0, 0, 1, 1], [], []>} : vector<9x6xf32>, vector<6x236xf32>, vector<9x236xf32> -> vector<9x236xf32>
    %51 = arith.addf %47, %50 : vector<9x236xf32>
    %c8_37 = arith.constant 8 : index
    %c54 = arith.constant 54 : index
    %52 = vector.load %arg1[%c8_37, %c54] : memref<624x152xf32, #tpu.memory_space<vmem>>, vector<9x6xf32>
    %c0_38 = arith.constant 0 : index
    %c16 = arith.constant 16 : index
    %53 = vector.load %arg3[%c0_38, %c16] : memref<6x288xf32, #tpu.memory_space<vmem>>, vector<6x236xf32>
    %cst_39 = arith.constant dense<0.000000e+00> : vector<9x236xf32>
    %54 = tpu.matmul %52, %53, %cst_39 {dimension_numbers = #tpu.dot_dimension_numbers<[1], [0], [0], [1], [0, 0, 1, 1], [], []>} : vector<9x6xf32>, vector<6x236xf32>, vector<9x236xf32> -> vector<9x236xf32>
    %55 = arith.addf %51, %54 : vector<9x236xf32>
    %c8_40 = arith.constant 8 : index
    %c60 = arith.constant 60 : index
    %56 = vector.load %arg1[%c8_40, %c60] : memref<624x152xf32, #tpu.memory_space<vmem>>, vector<9x6xf32>
    %c0_41 = arith.constant 0 : index
    %c24_42 = arith.constant 24 : index
    %57 = vector.load %arg3[%c0_41, %c24_42] : memref<6x288xf32, #tpu.memory_space<vmem>>, vector<6x236xf32>
    %cst_43 = arith.constant dense<0.000000e+00> : vector<9x236xf32>
    %58 = tpu.matmul %56, %57, %cst_43 {dimension_numbers = #tpu.dot_dimension_numbers<[1], [0], [0], [1], [0, 0, 1, 1], [], []>} : vector<9x6xf32>, vector<6x236xf32>, vector<9x236xf32> -> vector<9x236xf32>
    %59 = arith.addf %55, %58 : vector<9x236xf32>
    %c8_44 = arith.constant 8 : index
    %c66 = arith.constant 66 : index
    %60 = vector.load %arg1[%c8_44, %c66] : memref<624x152xf32, #tpu.memory_space<vmem>>, vector<9x6xf32>
    %c0_45 = arith.constant 0 : index
    %c25 = arith.constant 25 : index
    %61 = vector.load %arg3[%c0_45, %c25] : memref<6x288xf32, #tpu.memory_space<vmem>>, vector<6x236xf32>
    %cst_46 = arith.constant dense<0.000000e+00> : vector<9x236xf32>
    %62 = tpu.matmul %60, %61, %cst_46 {dimension_numbers = #tpu.dot_dimension_numbers<[1], [0], [0], [1], [0, 0, 1, 1], [], []>} : vector<9x6xf32>, vector<6x236xf32>, vector<9x236xf32> -> vector<9x236xf32>
    %63 = arith.addf %59, %62 : vector<9x236xf32>
    %c8_47 = arith.constant 8 : index
    %c72 = arith.constant 72 : index
    %64 = vector.load %arg1[%c8_47, %c72] : memref<624x152xf32, #tpu.memory_space<vmem>>, vector<9x6xf32>
    %c0_48 = arith.constant 0 : index
    %c26 = arith.constant 26 : index
    %65 = vector.load %arg3[%c0_48, %c26] : memref<6x288xf32, #tpu.memory_space<vmem>>, vector<6x236xf32>
    %cst_49 = arith.constant dense<0.000000e+00> : vector<9x236xf32>
    %66 = tpu.matmul %64, %65, %cst_49 {dimension_numbers = #tpu.dot_dimension_numbers<[1], [0], [0], [1], [0, 0, 1, 1], [], []>} : vector<9x6xf32>, vector<6x236xf32>, vector<9x236xf32> -> vector<9x236xf32>
    %67 = arith.addf %63, %66 : vector<9x236xf32>
    %c8_50 = arith.constant 8 : index
    %c78 = arith.constant 78 : index
    %68 = vector.load %arg1[%c8_50, %c78] : memref<624x152xf32, #tpu.memory_space<vmem>>, vector<9x6xf32>
    %c0_51 = arith.constant 0 : index
    %c27 = arith.constant 27 : index
    %69 = vector.load %arg3[%c0_51, %c27] : memref<6x288xf32, #tpu.memory_space<vmem>>, vector<6x236xf32>
    %cst_52 = arith.constant dense<0.000000e+00> : vector<9x236xf32>
    %70 = tpu.matmul %68, %69, %cst_52 {dimension_numbers = #tpu.dot_dimension_numbers<[1], [0], [0], [1], [0, 0, 1, 1], [], []>} : vector<9x6xf32>, vector<6x236xf32>, vector<9x236xf32> -> vector<9x236xf32>
    %71 = arith.addf %67, %70 : vector<9x236xf32>
    %c8_53 = arith.constant 8 : index
    %c84 = arith.constant 84 : index
    %72 = vector.load %arg1[%c8_53, %c84] : memref<624x152xf32, #tpu.memory_space<vmem>>, vector<9x6xf32>
    %c0_54 = arith.constant 0 : index
    %c28 = arith.constant 28 : index
    %73 = vector.load %arg3[%c0_54, %c28] : memref<6x288xf32, #tpu.memory_space<vmem>>, vector<6x236xf32>
    %cst_55 = arith.constant dense<0.000000e+00> : vector<9x236xf32>
    %74 = tpu.matmul %72, %73, %cst_55 {dimension_numbers = #tpu.dot_dimension_numbers<[1], [0], [0], [1], [0, 0, 1, 1], [], []>} : vector<9x6xf32>, vector<6x236xf32>, vector<9x236xf32> -> vector<9x236xf32>
    %75 = arith.addf %71, %74 : vector<9x236xf32>
    %c8_56 = arith.constant 8 : index
    %c90 = arith.constant 90 : index
    %76 = vector.load %arg1[%c8_56, %c90] : memref<624x152xf32, #tpu.memory_space<vmem>>, vector<9x6xf32>
    %c0_57 = arith.constant 0 : index
    %c36_58 = arith.constant 36 : index
    %77 = vector.load %arg3[%c0_57, %c36_58] : memref<6x288xf32, #tpu.memory_space<vmem>>, vector<6x236xf32>
    %cst_59 = arith.constant dense<0.000000e+00> : vector<9x236xf32>
    %78 = tpu.matmul %76, %77, %cst_59 {dimension_numbers = #tpu.dot_dimension_numbers<[1], [0], [0], [1], [0, 0, 1, 1], [], []>} : vector<9x6xf32>, vector<6x236xf32>, vector<9x236xf32> -> vector<9x236xf32>
    %79 = arith.addf %75, %78 : vector<9x236xf32>
    %c8_60 = arith.constant 8 : index
    %c96 = arith.constant 96 : index
    %80 = vector.load %arg1[%c8_60, %c96] : memref<624x152xf32, #tpu.memory_space<vmem>>, vector<9x6xf32>
    %c0_61 = arith.constant 0 : index
    %c37 = arith.constant 37 : index
    %81 = vector.load %arg3[%c0_61, %c37] : memref<6x288xf32, #tpu.memory_space<vmem>>, vector<6x236xf32>
    %cst_62 = arith.constant dense<0.000000e+00> : vector<9x236xf32>
    %82 = tpu.matmul %80, %81, %cst_62 {dimension_numbers = #tpu.dot_dimension_numbers<[1], [0], [0], [1], [0, 0, 1, 1], [], []>} : vector<9x6xf32>, vector<6x236xf32>, vector<9x236xf32> -> vector<9x236xf32>
    %83 = arith.addf %79, %82 : vector<9x236xf32>
    %c8_63 = arith.constant 8 : index
    %c102 = arith.constant 102 : index
    %84 = vector.load %arg1[%c8_63, %c102] : memref<624x152xf32, #tpu.memory_space<vmem>>, vector<9x6xf32>
    %c0_64 = arith.constant 0 : index
    %c38 = arith.constant 38 : index
    %85 = vector.load %arg3[%c0_64, %c38] : memref<6x288xf32, #tpu.memory_space<vmem>>, vector<6x236xf32>
    %cst_65 = arith.constant dense<0.000000e+00> : vector<9x236xf32>
    %86 = tpu.matmul %84, %85, %cst_65 {dimension_numbers = #tpu.dot_dimension_numbers<[1], [0], [0], [1], [0, 0, 1, 1], [], []>} : vector<9x6xf32>, vector<6x236xf32>, vector<9x236xf32> -> vector<9x236xf32>
    %87 = arith.addf %83, %86 : vector<9x236xf32>
    %c8_66 = arith.constant 8 : index
    %c108 = arith.constant 108 : index
    %88 = vector.load %arg1[%c8_66, %c108] : memref<624x152xf32, #tpu.memory_space<vmem>>, vector<9x6xf32>
    %c0_67 = arith.constant 0 : index
    %c39 = arith.constant 39 : index
    %89 = vector.load %arg3[%c0_67, %c39] : memref<6x288xf32, #tpu.memory_space<vmem>>, vector<6x236xf32>
    %cst_68 = arith.constant dense<0.000000e+00> : vector<9x236xf32>
    %90 = tpu.matmul %88, %89, %cst_68 {dimension_numbers = #tpu.dot_dimension_numbers<[1], [0], [0], [1], [0, 0, 1, 1], [], []>} : vector<9x6xf32>, vector<6x236xf32>, vector<9x236xf32> -> vector<9x236xf32>
    %91 = arith.addf %87, %90 : vector<9x236xf32>
    %c8_69 = arith.constant 8 : index
    %c114 = arith.constant 114 : index
    %92 = vector.load %arg1[%c8_69, %c114] : memref<624x152xf32, #tpu.memory_space<vmem>>, vector<9x6xf32>
    %c0_70 = arith.constant 0 : index
    %c40 = arith.constant 40 : index
    %93 = vector.load %arg3[%c0_70, %c40] : memref<6x288xf32, #tpu.memory_space<vmem>>, vector<6x236xf32>
    %cst_71 = arith.constant dense<0.000000e+00> : vector<9x236xf32>
    %94 = tpu.matmul %92, %93, %cst_71 {dimension_numbers = #tpu.dot_dimension_numbers<[1], [0], [0], [1], [0, 0, 1, 1], [], []>} : vector<9x6xf32>, vector<6x236xf32>, vector<9x236xf32> -> vector<9x236xf32>
    %95 = arith.addf %91, %94 : vector<9x236xf32>
    %c8_72 = arith.constant 8 : index
    %c120 = arith.constant 120 : index
    %96 = vector.load %arg1[%c8_72, %c120] : memref<624x152xf32, #tpu.memory_space<vmem>>, vector<9x6xf32>
    %c0_73 = arith.constant 0 : index
    %c48_74 = arith.constant 48 : index
    %97 = vector.load %arg3[%c0_73, %c48_74] : memref<6x288xf32, #tpu.memory_space<vmem>>, vector<6x236xf32>
    %cst_75 = arith.constant dense<0.000000e+00> : vector<9x236xf32>
    %98 = tpu.matmul %96, %97, %cst_75 {dimension_numbers = #tpu.dot_dimension_numbers<[1], [0], [0], [1], [0, 0, 1, 1], [], []>} : vector<9x6xf32>, vector<6x236xf32>, vector<9x236xf32> -> vector<9x236xf32>
    %99 = arith.addf %95, %98 : vector<9x236xf32>
    %c8_76 = arith.constant 8 : index
    %c126 = arith.constant 126 : index
    %100 = vector.load %arg1[%c8_76, %c126] : memref<624x152xf32, #tpu.memory_space<vmem>>, vector<9x6xf32>
    %c0_77 = arith.constant 0 : index
    %c49 = arith.constant 49 : index
    %101 = vector.load %arg3[%c0_77, %c49] : memref<6x288xf32, #tpu.memory_space<vmem>>, vector<6x236xf32>
    %cst_78 = arith.constant dense<0.000000e+00> : vector<9x236xf32>
    %102 = tpu.matmul %100, %101, %cst_78 {dimension_numbers = #tpu.dot_dimension_numbers<[1], [0], [0], [1], [0, 0, 1, 1], [], []>} : vector<9x6xf32>, vector<6x236xf32>, vector<9x236xf32> -> vector<9x236xf32>
    %103 = arith.addf %99, %102 : vector<9x236xf32>
    %c8_79 = arith.constant 8 : index
    %c132 = arith.constant 132 : index
    %104 = vector.load %arg1[%c8_79, %c132] : memref<624x152xf32, #tpu.memory_space<vmem>>, vector<9x6xf32>
    %c0_80 = arith.constant 0 : index
    %c50 = arith.constant 50 : index
    %105 = vector.load %arg3[%c0_80, %c50] : memref<6x288xf32, #tpu.memory_space<vmem>>, vector<6x236xf32>
    %cst_81 = arith.constant dense<0.000000e+00> : vector<9x236xf32>
    %106 = tpu.matmul %104, %105, %cst_81 {dimension_numbers = #tpu.dot_dimension_numbers<[1], [0], [0], [1], [0, 0, 1, 1], [], []>} : vector<9x6xf32>, vector<6x236xf32>, vector<9x236xf32> -> vector<9x236xf32>
    %107 = arith.addf %103, %106 : vector<9x236xf32>
    %c8_82 = arith.constant 8 : index
    %c138 = arith.constant 138 : index
    %108 = vector.load %arg1[%c8_82, %c138] : memref<624x152xf32, #tpu.memory_space<vmem>>, vector<9x6xf32>
    %c0_83 = arith.constant 0 : index
    %c51 = arith.constant 51 : index
    %109 = vector.load %arg3[%c0_83, %c51] : memref<6x288xf32, #tpu.memory_space<vmem>>, vector<6x236xf32>
    %cst_84 = arith.constant dense<0.000000e+00> : vector<9x236xf32>
    %110 = tpu.matmul %108, %109, %cst_84 {dimension_numbers = #tpu.dot_dimension_numbers<[1], [0], [0], [1], [0, 0, 1, 1], [], []>} : vector<9x6xf32>, vector<6x236xf32>, vector<9x236xf32> -> vector<9x236xf32>
    %111 = arith.addf %107, %110 : vector<9x236xf32>
    %c8_85 = arith.constant 8 : index
    %c144 = arith.constant 144 : index
    %112 = vector.load %arg1[%c8_85, %c144] : memref<624x152xf32, #tpu.memory_space<vmem>>, vector<9x6xf32>
    %c0_86 = arith.constant 0 : index
    %c52 = arith.constant 52 : index
    %113 = vector.load %arg3[%c0_86, %c52] : memref<6x288xf32, #tpu.memory_space<vmem>>, vector<6x236xf32>
    %cst_87 = arith.constant dense<0.000000e+00> : vector<9x236xf32>
    %114 = tpu.matmul %112, %113, %cst_87 {dimension_numbers = #tpu.dot_dimension_numbers<[1], [0], [0], [1], [0, 0, 1, 1], [], []>} : vector<9x6xf32>, vector<6x236xf32>, vector<9x236xf32> -> vector<9x236xf32>
    %115 = arith.addf %111, %114 : vector<9x236xf32>
    %c24_88 = arith.constant 24 : index
    %c0_89 = arith.constant 0 : index
    %116 = vector.load %arg1[%c24_88, %c0_89] : memref<624x152xf32, #tpu.memory_space<vmem>>, vector<236x128xf32>
    %cst_90 = arith.constant dense<0.000000e+00> : vector<9x128xf32>
    %117 = tpu.matmul %115, %116, %cst_90 {dimension_numbers = #tpu.dot_dimension_numbers<[1], [0], [0], [1], [0, 0, 1, 1], [], []>} : vector<9x236xf32>, vector<236x128xf32>, vector<9x128xf32> -> vector<9x128xf32>
    %c32_i32 = arith.constant 32 : i32
    %118 = tpu.dynamic_rotate %117 by %c32_i32 dim 1 : vector<9x128xf32>, i32 -> vector<9x128xf32>
    %119 = arith.maximumf %117, %118 : vector<9x128xf32>
    %c64_i32 = arith.constant 64 : i32
    %120 = tpu.dynamic_rotate %117 by %c64_i32 dim 1 : vector<9x128xf32>, i32 -> vector<9x128xf32>
    %c96_i32 = arith.constant 96 : i32
    %121 = tpu.dynamic_rotate %117 by %c96_i32 dim 1 : vector<9x128xf32>, i32 -> vector<9x128xf32>
    %122 = arith.maximumf %120, %121 : vector<9x128xf32>
    %123 = arith.maximumf %119, %122 : vector<9x128xf32>
    %124 = vector.extract_strided_slice %123 {offsets = [0, 0], sizes = [9, 32], strides = [1, 1]} : vector<9x128xf32> to vector<9x32xf32>
    %125 = vector.broadcast %16 : vector<9x1xf32> to vector<9x32xf32>
    %126 = arith.addf %124, %125 : vector<9x32xf32>
    %cst_91 = arith.constant 0.000000e+00 : f32
    %127 = vector.broadcast %cst_91 : f32 to vector<9x32xf32>
    %128 = arith.maximumf %126, %127 : vector<9x32xf32>
    %c264 = arith.constant 264 : index
    %c0_92 = arith.constant 0 : index
    %129 = vector.load %arg1[%c264, %c0_92] : memref<624x152xf32, #tpu.memory_space<vmem>>, vector<9x144xf32>
    %c280 = arith.constant 280 : index
    %c0_93 = arith.constant 0 : index
    %130 = vector.load %arg1[%c280, %c0_93] : memref<624x152xf32, #tpu.memory_space<vmem>>, vector<32x144xf32>
    %c312 = arith.constant 312 : index
    %c0_94 = arith.constant 0 : index
    %131 = vector.load %arg1[%c312, %c0_94] : memref<624x152xf32, #tpu.memory_space<vmem>>, vector<2x32xf32>
    %132 = tpu.transpose %128, [1, 0] : vector<9x32xf32> -> vector<32x9xf32>
    %cst_95 = arith.constant dense<0.000000e+00> : vector<32x144xf32>
    %133 = tpu.matmul %132, %129, %cst_95 {dimension_numbers = #tpu.dot_dimension_numbers<[1], [0], [0], [1], [0, 0, 1, 1], [], []>} : vector<32x9xf32>, vector<9x144xf32>, vector<32x144xf32> -> vector<32x144xf32>
    %134 = arith.mulf %133, %130 : vector<32x144xf32>
    %cst_96 = arith.constant dense<0.000000e+00> : vector<2x144xf32>
    %135 = tpu.matmul %131, %134, %cst_96 {dimension_numbers = #tpu.dot_dimension_numbers<[1], [0], [0], [1], [0, 0, 1, 1], [], []>} : vector<2x32xf32>, vector<32x144xf32>, vector<2x144xf32> -> vector<2x144xf32>
    %c320 = arith.constant 320 : index
    %c0_97 = arith.constant 0 : index
    %136 = vector.load %arg1[%c320, %c0_97] : memref<624x152xf32, #tpu.memory_space<vmem>>, vector<144x72xf32>
    %c464 = arith.constant 464 : index
    %c0_98 = arith.constant 0 : index
    %137 = vector.load %arg1[%c464, %c0_98] : memref<624x152xf32, #tpu.memory_space<vmem>>, vector<1x72xf32>
    %cst_99 = arith.constant dense<0.000000e+00> : vector<2x72xf32>
    %138 = tpu.matmul %135, %136, %cst_99 {dimension_numbers = #tpu.dot_dimension_numbers<[1], [0], [0], [1], [0, 0, 1, 1], [], []>} : vector<2x144xf32>, vector<144x72xf32>, vector<2x72xf32> -> vector<2x72xf32>
    %139 = vector.broadcast %137 : vector<1x72xf32> to vector<2x72xf32>
    %140 = arith.addf %138, %139 : vector<2x72xf32>
    %cst_100 = arith.constant 0.000000e+00 : f32
    %141 = vector.broadcast %cst_100 : f32 to vector<2x72xf32>
    %142 = arith.maximumf %140, %141 : vector<2x72xf32>
    %c472 = arith.constant 472 : index
    %c0_101 = arith.constant 0 : index
    %143 = vector.load %arg1[%c472, %c0_101] : memref<624x152xf32, #tpu.memory_space<vmem>>, vector<72x48xf32>
    %c544 = arith.constant 544 : index
    %c0_102 = arith.constant 0 : index
    %144 = vector.load %arg1[%c544, %c0_102] : memref<624x152xf32, #tpu.memory_space<vmem>>, vector<1x48xf32>
    %cst_103 = arith.constant dense<0.000000e+00> : vector<2x48xf32>
    %145 = tpu.matmul %142, %143, %cst_103 {dimension_numbers = #tpu.dot_dimension_numbers<[1], [0], [0], [1], [0, 0, 1, 1], [], []>} : vector<2x72xf32>, vector<72x48xf32>, vector<2x48xf32> -> vector<2x48xf32>
    %146 = vector.broadcast %144 : vector<1x48xf32> to vector<2x48xf32>
    %147 = arith.addf %145, %146 : vector<2x48xf32>
    %cst_104 = arith.constant 0.000000e+00 : f32
    %148 = vector.broadcast %cst_104 : f32 to vector<2x48xf32>
    %149 = arith.maximumf %147, %148 : vector<2x48xf32>
    %c552 = arith.constant 552 : index
    %c0_105 = arith.constant 0 : index
    %150 = vector.load %arg1[%c552, %c0_105] : memref<624x152xf32, #tpu.memory_space<vmem>>, vector<48x12xf32>
    %c600 = arith.constant 600 : index
    %c0_106 = arith.constant 0 : index
    %151 = vector.load %arg1[%c600, %c0_106] : memref<624x152xf32, #tpu.memory_space<vmem>>, vector<1x12xf32>
    %cst_107 = arith.constant dense<0.000000e+00> : vector<2x12xf32>
    %152 = tpu.matmul %149, %150, %cst_107 {dimension_numbers = #tpu.dot_dimension_numbers<[1], [0], [0], [1], [0, 0, 1, 1], [], []>} : vector<2x48xf32>, vector<48x12xf32>, vector<2x12xf32> -> vector<2x12xf32>
    %153 = vector.broadcast %151 : vector<1x12xf32> to vector<2x12xf32>
    %154 = arith.addf %152, %153 : vector<2x12xf32>
    %cst_108 = arith.constant 0.000000e+00 : f32
    %155 = vector.broadcast %cst_108 : f32 to vector<2x12xf32>
    %156 = arith.maximumf %154, %155 : vector<2x12xf32>
    %c608 = arith.constant 608 : index
    %c0_109 = arith.constant 0 : index
    %157 = vector.load %arg1[%c608, %c0_109] : memref<624x152xf32, #tpu.memory_space<vmem>>, vector<12x3xf32>
    %c620 = arith.constant 620 : index
    %c0_110 = arith.constant 0 : index
    %158 = vector.load %arg1[%c620, %c0_110] : memref<624x152xf32, #tpu.memory_space<vmem>>, vector<1x3xf32>
    %cst_111 = arith.constant dense<0.000000e+00> : vector<2x3xf32>
    %159 = tpu.matmul %156, %157, %cst_111 {dimension_numbers = #tpu.dot_dimension_numbers<[1], [0], [0], [1], [0, 0, 1, 1], [], []>} : vector<2x12xf32>, vector<12x3xf32>, vector<2x3xf32> -> vector<2x3xf32>
    %160 = vector.broadcast %158 : vector<1x3xf32> to vector<2x3xf32>
    %161 = arith.addf %159, %160 : vector<2x3xf32>
    %c0_112 = arith.constant 0 : index
    %c0_113 = arith.constant 0 : index
    %162 = vector.load %arg2[%c0_112, %c0_113] : memref<2x3xf32, #tpu.memory_space<vmem>>, vector<2x3xf32>
    tpu.vector_store %arg2[%c0_112, %c0_113], %161 {strides = array<i32>} : memref<2x3xf32, #tpu.memory_space<vmem>>, vector<2x3xf32>,
    return
  }
}

</mosaic_0001>

<bundles_post_ra>
// kernel: network_forward.1
= control target key start
LH: loop header
LB: loop body
LE: loop exit
PB: predicated region body
PF: predicated region fallthrough
CT: control target
= control target key end

     0   :  { %vm107_vm0 = vcmask 1042432   ;;  %vm103_vm1 = vcmask 613376   ;;  %s4260_s0 = inlined_call_operand.vmem [shape: f32[75,1152], index: 0, kind: input, shape index: {}]   ;;  %s4261_s1 = inlined_call_operand.vmem [shape: f32[624,152], index: 1, kind: input, shape index: {}]   ;;  %s4262_s2 = inlined_call_operand.hbm [shape: f32[2,3], index: 2, kind: output, shape index: {}]  }
   0x1   :  { %v95_v0 = vld [vmem:[%s4260_s0 + $0x290] sm:$0x7]  ;;  %v97_v1 = vld [vmem:[%s4260_s0 + $0x2a0] sm:$0x7]  ;;  %v86_v2 = vld [vmem:[%s4260_s0 + $0x248] sm:$0xff] }
   0x2   :  { %2607 = vmatpush.msk.msra.mxu1 %vm107_vm0, %v95_v0  ;;  %2611 = vmatpush.msk.msra.mxu3 %vm107_vm0, %v97_v1  ;;  %v88_v3 = vld [vmem:[%s4260_s0 + $0x258] sm:$0xff]  ;;  %v94_v4 = vld [vmem:[%s4260_s0 + $0x288] sm:$0x7]  ;;  %v77_v5 = vld [vmem:[%s4260_s0 + $0x200] sm:$0xff] }
   0x3   :  { %2605 = vmatpush.msk.msra.mxu0 %vm107_vm0, %v94_v4  ;;  %v79_v6 = vld [vmem:[%s4260_s0 + $0x210] sm:$0xff]  ;;  %v85_v7 = vld [vmem:[%s4260_s0 + $0x240] sm:$0xff]  ;;  %v76_v8 = vld [vmem:[%s4260_s0 + $0x1f8] sm:$0xff] }
   0x4   :  { %162 = vmatpush.msra.mxu1 %v86_v2  ;;  %202 = vmatpush.msra.mxu3 %v88_v3  ;;  %v68_v9 = vld [vmem:[%s4260_s0 + $0x1b8] sm:$0xff]  ;;  %v70_v10 = vld [vmem:[%s4260_s0 + $0x1c8] sm:$0xff]  ;;  %v67_v12 = vld [vmem:[%s4260_s0 + $0x1b0] sm:$0xff] }
   0x5   :  { %142 = vmatpush.msra.mxu0 %v85_v7  ;;  %v96_v11 = vld [vmem:[%s4260_s0 + $0x298] sm:$0x7]  ;;  %v87_v13 = vld [vmem:[%s4260_s0 + $0x250] sm:$0xff]  ;;  %v61_v15 = vld [vmem:[%s4260_s0 + $0x180] sm:$0xff] }
   0x6   :  { %163 = vmatpush.msra.mxu1 %v77_v5  ;;  %203 = vmatpush.msra.mxu3 %v79_v6  ;;  %v59_v14 = vld [vmem:[%s4260_s0 + $0x170] sm:$0xff]  ;;  %v58_v16 = vld [vmem:[%s4260_s0 + $0x168] sm:$0xff]  ;;  %v52_v19 = vld [vmem:[%s4260_s0 + $0x138] sm:$0xff] }
   0x7   :  { %143 = vmatpush.msra.mxu0 %v76_v8  ;;  %2609 = vmatpush.msk.msra.mxu2 %vm107_vm0, %v96_v11  ;;  %v78_v17 = vld [vmem:[%s4260_s0 + $0x208] sm:$0xff]  ;;  %v49_v20 = vld [vmem:[%s4260_s0 + $0x120] sm:$0xff]  ;;  %v43_v23 = vld [vmem:[%s4260_s0 + $0xf0] sm:$0xff] }
   0x8   :  { %164 = vmatpush.msra.mxu1 %v68_v9  ;;  %204 = vmatpush.msra.mxu3 %v70_v10  ;;  %v50_v18 = vld [vmem:[%s4260_s0 + $0x128] sm:$0xff]  ;;  %v69_v21 = vld [vmem:[%s4260_s0 + $0x1c0] sm:$0xff]  ;;  %v40_v24 = vld [vmem:[%s4260_s0 + $0xd8] sm:$0xff] }
   0x9   :  { %144 = vmatpush.msra.mxu0 %v67_v12  ;;  %182 = vmatpush.msra.mxu2 %v87_v13  ;;  %v41_v22 = vld [vmem:[%s4260_s0 + $0xe0] sm:$0xff]  ;;  %v60_v25 = vld [vmem:[%s4260_s0 + $0x178] sm:$0xff]  ;;  %v34_v27 = vld [vmem:[%s4260_s0 + $0xa8] sm:$0xff] }
   0xa   :  { %165 = vmatpush.msra.mxu1 %v59_v14  ;;  %205 = vmatpush.msra.mxu3 %v61_v15  ;;  %v32_v26 = vld [vmem:[%s4260_s0 + $0x98] sm:$0xff]  ;;  %v31_v28 = vld [vmem:[%s4260_s0 + $0x90] sm:$0xff]  ;;  %v25_v31 = vld [vmem:[%s4260_s0 + $0x60] sm:$0xff] }
   0xb   :  { %145 = vmatpush.msra.mxu0 %v58_v16  ;;  %183 = vmatpush.msra.mxu2 %v78_v17  ;;  %v51_v29 = vld [vmem:[%s4260_s0 + $0x130] sm:$0xff]  ;;  %v22_v32 = vld [vmem:[%s4260_s0 + $0x48] sm:$0xff]  ;;  %v16_v35 = vld [vmem:[%s4260_s0 + $0x18] sm:$0xff] }
   0xc   :  { %166 = vmatpush.msra.mxu1 %v50_v18  ;;  %206 = vmatpush.msra.mxu3 %v52_v19  ;;  %v23_v30 = vld [vmem:[%s4260_s0 + $0x50] sm:$0xff]  ;;  %v42_v33 = vld [vmem:[%s4260_s0 + $0xe8] sm:$0xff]  ;;  %v3050_v36 = vld [vmem:[%s4261_s1] sm:$0x3f] }
   0xd   :  { %146 = vmatpush.msra.mxu0 %v49_v20  ;;  %184 = vmatpush.msra.mxu2 %v69_v21  ;;  %v14_v34 = vld [vmem:[%s4260_s0 + $0x8] sm:$0xff]  ;;  %v99_v37 = vld [vmem:[%s4260_s0 + $0x2b0] sm:$0x7]  ;;  %v101_v38 = vld [vmem:[%s4260_s0 + $0x2c0] sm:$0x7] }
   0xe   :  { %167 = vmatpush.msra.mxu1 %v41_v22  ;;  %207 = vmatpush.msra.mxu3 %v43_v23  ;;  %v13_v39 = vld [vmem:[%s4260_s0] sm:$0xff]  ;;  %v90_v40 = vld [vmem:[%s4260_s0 + $0x268] sm:$0xff]  ;;  %v92_v42 = vld [vmem:[%s4260_s0 + $0x278] sm:$0xff] }
   0xf   :  { %147 = vmatpush.msra.mxu0 %v40_v24  ;;  %185 = vmatpush.msra.mxu2 %v60_v25  ;;  %v33_v41 = vld [vmem:[%s4260_s0 + $0xa0] sm:$0xff]  ;;  %v98_v43 = vld [vmem:[%s4260_s0 + $0x2a8] sm:$0x7]  ;;  %v24_v45 = vld [vmem:[%s4260_s0 + $0x58] sm:$0xff] }
  0x10   :  { %168 = vmatpush.msra.mxu1 %v32_v26  ;;  %208 = vmatpush.msra.mxu3 %v34_v27  ;;  %v81_v44 = vld [vmem:[%s4260_s0 + $0x220] sm:$0xff]  ;;  %v83_v46 = vld [vmem:[%s4260_s0 + $0x230] sm:$0xff]  ;;  %v72_v48 = vld [vmem:[%s4260_s0 + $0x1d8] sm:$0xff] }
  0x11   :  { %148 = vmatpush.msra.mxu0 %v31_v28  ;;  %186 = vmatpush.msra.mxu2 %v51_v29  ;;  %v89_v47 = vld [vmem:[%s4260_s0 + $0x260] sm:$0xff]  ;;  %v15_v49 = vld [vmem:[%s4260_s0 + $0x10] sm:$0xff]  ;;  %v74_v50 = vld [vmem:[%s4260_s0 + $0x1e8] sm:$0xff] }
  0x12   :  { %169 = vmatpush.msra.mxu1 %v23_v30  ;;  %209 = vmatpush.msra.mxu3 %v25_v31  ;;  %v80_v51 = vld [vmem:[%s4260_s0 + $0x218] sm:$0xff]  ;;  %v63_v52 = vld [vmem:[%s4260_s0 + $0x190] sm:$0xff]  ;;  %v65_v54 = vld [vmem:[%s4260_s0 + $0x1a0] sm:$0xff] }
  0x13   :  { %149 = vmatpush.msra.mxu0 %v22_v32  ;;  %187 = vmatpush.msra.mxu2 %v42_v33  ;;  %v100_v53 = vld [vmem:[%s4260_s0 + $0x2b8] sm:$0x7]  ;;  %v71_v55 = vld [vmem:[%s4260_s0 + $0x1d0] sm:$0xff]  ;;  %v54_v56 = vld [vmem:[%s4260_s0 + $0x148] sm:$0xff] }
  0x14   :  { %170 = vmatpush.msra.mxu1 %v14_v34  ;;  %210 = vmatpush.msra.mxu3 %v16_v35  ;;  %v91_v57 = vld [vmem:[%s4260_s0 + $0x270] sm:$0xff]  ;;  %v56_v58 = vld [vmem:[%s4260_s0 + $0x158] sm:$0xff]  ;;  %v62_v59 = vld [vmem:[%s4260_s0 + $0x188] sm:$0xff] }
  0x15   :  { %2612 = vmatmul.msk.f32.vlgmr.msra.gmra.mxu3 %vm103_vm1, %v3050_v36  ;;  %150 = vmatpush.msra.mxu0 %v13_v39  ;;  %v45_v60 = vld [vmem:[%s4260_s0 + $0x100] sm:$0xff]  ;;  %v82_v61 = vld [vmem:[%s4260_s0 + $0x228] sm:$0xff] }
  0x16   :  { %2615 = vmatpush.msk.msrb.mxu1 %vm107_vm0, %v99_v37  ;;  %2619 = vmatpush.msk.msrb.mxu3 %vm107_vm0, %v101_v38 }
  0x17   :  { %188 = vmatpush.msra.mxu2 %v33_v41  ;;  %2613 = vmatpush.msk.msrb.mxu0 %vm107_vm0, %v98_v43 }
  0x18   :  { %242 = vmatpush.msrb.mxu1 %v90_v40  ;;  %282 = vmatpush.msrb.mxu3 %v92_v42 }
  0x19   :  { %189 = vmatpush.msra.mxu2 %v24_v45  ;;  %222 = vmatpush.msrb.mxu0 %v89_v47 }
  0x1a   :  { %243 = vmatpush.msrb.mxu1 %v81_v44  ;;  %283 = vmatpush.msrb.mxu3 %v83_v46 }
  0x1b   :  { %190 = vmatpush.msra.mxu2 %v15_v49  ;;  %223 = vmatpush.msrb.mxu0 %v80_v51 }
  0x1c   :  { %244 = vmatpush.msrb.mxu1 %v72_v48  ;;  %284 = vmatpush.msrb.mxu3 %v74_v50 }
  0x1d   :  { %2610 = vmatmul.msk.f32.vlgmr.msra.gmra.mxu2 %vm103_vm1, %v3050_v36  ;;  %224 = vmatpush.msrb.mxu0 %v71_v55 }
  0x1e   :  { %245 = vmatpush.msrb.mxu1 %v63_v52  ;;  %2617 = vmatpush.msk.msrb.mxu2 %vm107_vm0, %v100_v53 }
  0x1f   :  { %285 = vmatpush.msrb.mxu3 %v65_v54 }
  0x20   :  { %246 = vmatpush.msrb.mxu1 %v54_v56 }
  0x21   :  { %7 = vsyncpa [#allocation4], 0  ;;  %262 = vmatpush.msrb.mxu2 %v91_v57  ;;  %286 = vmatpush.msrb.mxu3 %v56_v58  ;;  %v47_v62 = vld [vmem:[%s4260_s0 + $0x110] sm:$0xff]  ;;  %v53_v63 = vld [vmem:[%s4260_s0 + $0x140] sm:$0xff]  ;;  %s2873_s5 = smov 122   ;;  %v2874_v20 = vmov 75  }
  0x22   :  { %2608 = vmatmul.msk.f32.vlgmr.msra.gmra.mxu1 %vm103_vm1, %v3050_v36  ;;  %225 = vmatpush.msrb.mxu0 %v62_v59  ;;  %v36_v0 = vld [vmem:[%s4260_s0 + $0xb8] sm:$0xff]  ;;  %v73_v1 = vld [vmem:[%s4260_s0 + $0x1e0] sm:$0xff]  ;;  %v38_v2 = vld [vmem:[%s4260_s0 + $0xc8] sm:$0xff]  ;;  %s2875_s14 = smov 104   ;;  %s2876_s23 = smov 116   ;;  %v323_v59 = vlaneseq  ;;  %vm401_vm5 = vcmask 1045504  }
  0x23   :  { %247 = vmatpush.msrb.mxu1 %v45_v60  ;;  %263 = vmatpush.msrb.mxu2 %v82_v61  ;;  %v44_v3 = vld [vmem:[%s4260_s0 + $0xf8] sm:$0xff]  ;;  %v27_v4 = vld [vmem:[%s4260_s0 + $0x70] sm:$0xff]  ;;  %v29_v6 = vld [vmem:[%s4260_s0 + $0x80] sm:$0xff]  ;;  %s2877_s24 = smov 98   ;;  %s2878_s3 = smov 80   ;;  %vm374_vm6 = vcmask 259072  }
  0x24   :  { %287 = vmatpush.msrb.mxu3 %v47_v62  ;;  %226 = vmatpush.msrb.mxu0 %v53_v63  ;;  %v64_v5 = vld [vmem:[%s4260_s0 + $0x198] sm:$0xff]  ;;  %v35_v7 = vld [vmem:[%s4260_s0 + $0xb0] sm:$0xff]  ;;  %v18_v8 = vld [vmem:[%s4260_s0 + $0x28] sm:$0xff]  ;;  %s2879_s4 = smov 110   ;;  %s2882_s6 = smov 96   ;;  %v324_v62 = vand.u32 127, %v323_v59 }
  0x25   :  { %2606 = vmatmul.msk.f32.vlgmr.msra.gmra.mxu0 %vm103_vm1, %v3050_v36  ;;  %248 = vmatpush.msrb.mxu1 %v36_v0  ;;  %v55_v9 = vld [vmem:[%s4260_s0 + $0x150] sm:$0xff]  ;;  %v20_v10 = vld [vmem:[%s4260_s0 + $0x38] sm:$0xff]  ;;  %v26_v11 = vld [vmem:[%s4260_s0 + $0x68] sm:$0xff]  ;;  %s2883_s7 = smov 32   ;;  %s2884_s8 = smov 64   ;;  %vm396_vm7 = vcmask 48128  }
  0x26   :  { %264 = vmatpush.msrb.mxu2 %v73_v1  ;;  %288 = vmatpush.msrb.mxu3 %v38_v2  ;;  %v46_v12 = vld [vmem:[%s4260_s0 + $0x108] sm:$0xff]  ;;  %v17_v13 = vld [vmem:[%s4260_s0 + $0x20] sm:$0xff]  ;;  %v3190_v14 = vld [vmem:[%s4261_s1 + $0x10] sm:$0xff]  ;;  %s2885_s9 = smov 68   ;;  %s2886_s10 = smov 62   ;;  %vm340_vm2 = vcmp.lt.s32.totalorder %v324_v62, 64 }
  0x27   :  { %227 = vmatpush.msrb.mxu0 %v44_v3  ;;  %249 = vmatpush.msrb.mxu1 %v27_v4  ;;  %v37_v15 = vld [vmem:[%s4260_s0 + $0xc0] sm:$0xff]  ;;  %v102_v16 = vld [vmem:[%s4260_s0 + $0x2c8] sm:$0x7]  ;;  %v28_v17 = vld [vmem:[%s4260_s0 + $0x78] sm:$0xff]  ;;  %s2887_s11 = smov 74   ;;  %s2888_s12 = smov 56  }
  0x28   :  { %265 = vmatpush.msrb.mxu2 %v64_v5  ;;  %289 = vmatpush.msrb.mxu3 %v29_v6  ;;  %v93_v18 = vld [vmem:[%s4260_s0 + $0x280] sm:$0xff]  ;;  %v19_v19 = vld [vmem:[%s4260_s0 + $0x30] sm:$0xff]  ;;  %v84_v21 = vld [vmem:[%s4260_s0 + $0x238] sm:$0xff]  ;;  %vm352_vm3 = vcmp.lt.s32.totalorder %v324_v62, 96  ;;  %vm325_vm4 = vcmp.lt.s32.totalorder %v324_v62, 32  ;;  %s2889_s13 = smov 127  }
  0x29   :  { %228 = vmatpush.msrb.mxu0 %v35_v7  ;;  %250 = vmatpush.msrb.mxu1 %v18_v8  ;;  %v3221_v22 = vld [vmem:[%s4261_s1 + $0x20] sm:$0x1]  ;;  %v75_v23 = vld [vmem:[%s4260_s0 + $0x1f0] sm:$0xff]  ;;  %v66_v24 = vld [vmem:[%s4260_s0 + $0x1a8] sm:$0xff]  ;;  %s2890_s15 = smov 113   ;;  %s2891_s16 = smov 126  }
  0x2a   :  { %266 = vmatpush.msrb.mxu2 %v55_v9  ;;  %290 = vmatpush.msrb.mxu3 %v20_v10  ;;  %v57_v25 = vld [vmem:[%s4260_s0 + $0x160] sm:$0xff]  ;;  %v48_v26 = vld [vmem:[%s4260_s0 + $0x118] sm:$0xff]  ;;  %v39_v27 = vld [vmem:[%s4260_s0 + $0xd0] sm:$0xff]  ;;  %s2892_s17 = smov 124   ;;  %s2893_s18 = smov 114   ;;  %vm582_vm8 = vcmask 1022976  }
  0x2b   :  { %229 = vmatpush.msrb.mxu0 %v26_v11  ;;  %2616 = vmatmul.msk.f32.vlgmr.msrb.gmra.mxu1 %vm103_vm1, %v3050_v36  ;;  %v30_v28 = vld [vmem:[%s4260_s0 + $0x88] sm:$0xff]  ;;  %v21_v29 = vld [vmem:[%s4260_s0 + $0x40] sm:$0xff]  ;;  %s2881_s0 = smov 92   ;;  %s2894_s19 = smov 115   ;;  %vm394_vm9 = vcmask 1039360   ;;  %vm514_vm10 = vcmask 1031168  }
  0x2c   :  { %2620 = vmatmul.msk.f32.vlgmr.msrb.gmra.mxu3 %vm103_vm1, %v3050_v36  ;;  %267 = vmatpush.msrb.mxu2 %v46_v12  ;;  %s2895_s20 = smov 125   ;;  %s2896_s21 = smov 112   ;;  %vm650_vm11 = vcmask 1014784   ;;  %vm786_vm12 = vcmask 941056   ;;  %vm922_vm13 = vcmask 924672   ;;  %vm718_vm14 = vcmask 949248  }
  0x2d   :  { %230 = vmatpush.msrb.mxu0 %v17_v13  ;;  %384 = vrot.lane.b32.xlu2 %v3190_v14, %s2873_s5  ;;  %s2897_s22 = smov 103   ;;  %s2899_s25 = smov 102   ;;  %vm1066_vm15 = vcmask 850944  }
  0x2e   :  { %2614 = vmatmul.msk.f32.vlgmr.msrb.gmra.mxu0 %vm103_vm1, %v3050_v36  ;;  %268 = vmatpush.msrb.mxu2 %v37_v15  ;;  %s2900_s26 = smov 100   ;;  %s2901_s27 = smov 50  }
  0x2f   :  { %2621 = vmatpush.msk.msra.mxu0 %vm107_vm0, %v102_v16  ;;  %2841 = vset.pattern.permute.xlu0 %v2874_v20  ;;  %s2902_s28 = smov 44   ;;  %s2903_s29 = smov 91   ;;  %vm854_vm0 = vcmask 932864  }
  0x30   :  { %269 = vmatpush.msrb.mxu2 %v28_v17  ;;  %363 = vperm.xlu0 %2841, %v3050_v36   ;;  %s2904_s30 = smov 38  }
  0x31   :  { %302 = vmatpush.msra.mxu0 %v93_v18  ;;  %644 = vrot.lane.b32.xlu1 %v3221_v22, %s2875_s14 }
  0x32   :  { %270 = vmatpush.msrb.mxu2 %v19_v19 }
  0x33   :  { %303 = vmatpush.msra.mxu0 %v84_v21  ;;  %2618 = vmatmul.msk.f32.vlgmr.msrb.gmra.mxu2 %vm103_vm1, %v3050_v36 }
  0x35   :  { %304 = vmatpush.msra.mxu0 %v75_v23  ;;  %386 = vrot.lane.b32.xlu2 %v3221_v22, %s2873_s5  ;;  %s2880_s5 = smov 86  }
  0x37   :  { %305 = vmatpush.msra.mxu0 %v66_v24 }
  0x38   :  { %508 = vrot.lane.b32.xlu0 %v3221_v22, %s2876_s23 }
  0x39   :  { %306 = vmatpush.msra.mxu0 %v57_v25  ;;  %712 = vrot.lane.b32.xlu1 %v3221_v22, %s2877_s24 }
  0x3b   :  { %307 = vmatpush.msra.mxu0 %v48_v26 }
  0x3d   :  { %308 = vmatpush.msra.mxu0 %v39_v27  ;;  %506 = vrot.lane.b32.xlu2 %v3190_v14, %s2876_s23 }
  0x3f   :  { %309 = vmatpush.msra.mxu0 %v30_v28 }
  0x40   :  { %642 = vrot.lane.b32.xlu0 %v3190_v14, %s2875_s14 }
  0x41   :  { %310 = vmatpush.msra.mxu0 %v21_v29  ;;  %914 = vrot.lane.b32.xlu1 %v3190_v14, %s2878_s3 }
  0x42   :  { %2622 = vmatmul.msk.f32.vlgmr.msra.gmra.mxu0 %vm103_vm1, %v3050_v36  ;;  %vm990_vm1 = vcmask 916480  }
  0x45   :  { %576 = vrot.lane.b32.xlu2 %v3221_v22, %s2879_s4 }
  0x48   :  { %574 = vrot.lane.b32.xlu0 %v3190_v14, %s2879_s4  ;;  %s2905_s4 = smov 20  }
  0x49   :  { %846 = vrot.lane.b32.xlu1 %v3190_v14, %s2880_s5 }
  0x4d   :  { %778 = vrot.lane.b32.xlu2 %v3190_v14, %s2881_s0 }
  0x50   :  { %780 = vrot.lane.b32.xlu0 %v3221_v22, %s2881_s0 }
  0x55   :  { %710 = vrot.lane.b32.xlu2 %v3190_v14, %s2877_s24  ;;  %s2898_s24 = smov 101  }
  0x87   :  { %v3298_v39 = vpop.permute.xlu2 %384 }
  0x8f   :  { %v3302_v40 = vpop.permute.xlu2 %386 }
  0x97   :  { %v3306_v41 = vpop.permute.xlu2 %506 }
  0x98   :  { %v212_v30 = vpop.f32.mrf.mxu3 }
  0x99   :  { %346 = vrot.lane.b32.xlu2 %v212_v30, %s2882_s6 }
  0x9f   :  { %v3271_v31 = vpop.f32.mrf.mxu1  ;;  %v3308_v43 = vpop.permute.xlu2 %576 }
  0xa0   :  { %v3273_v32 = vpop.f32.mrf.mxu2 }
  0xa1   :  { %344 = vrot.lane.b32.xlu2 %v3273_v32, %s2882_s6 }
  0xa2   :  { %v3275_v33 = vpop.f32.mrf.mxu0  ;;  %v364_v42 = vpop.permute.xlu0 %363 }
  0xa3   :  { %315 = vrot.lane.b32.xlu0 %v3275_v33, %s2883_s7  ;;  %v3312_v45 = vpop.permute.xlu1 %644 }
  0xa7   :  { %v3314_v46 = vpop.permute.xlu2 %778 }
  0xa8   :  { %v252_v34 = vpop.f32.mrf.mxu1 }
  0xa9   :  { %334 = vrot.lane.b32.xlu1 %v252_v34, %s2884_s8 }
  0xaa   :  { %v3310_v44 = vpop.permute.xlu0 %508 }
  0xab   :  { %v232_v35 = vpop.f32.mrf.mxu0  ;;  %v3318_v48 = vpop.permute.xlu1 %712 }
  0xac   :  { %348 = vrot.lane.b32.xlu2 %v232_v35, %s2882_s6 }
  0xaf   :  { %v292_v36 = vpop.f32.mrf.mxu3  ;;  %v3320_v49 = vpop.permute.xlu2 %710 }
  0xb0   :  { %319 = vrot.lane.b32.xlu0 %v292_v36, %s2883_s7 }
  0xb1   :  { %332 = vrot.lane.b32.xlu1 %v232_v35, %s2884_s8 }
  0xb2   :  { %v3316_v47 = vpop.permute.xlu0 %642 }
  0xb3   :  { %v3324_v51 = vpop.permute.xlu1 %914 }
  0xb4   :  { %916 = vrot.lane.b32.xlu2 %v3221_v22, %s2878_s3 }
  0xb6   :  { %v272_v37 = vpop.f32.mrf.mxu2 }
  0xb8   :  { %317 = vrot.lane.b32.xlu0 %v272_v37, %s2883_s7 }
  0xb9   :  { %336 = vrot.lane.b32.xlu1 %v272_v37, %s2884_s8 }
  0xba   :  { %v3322_v50 = vpop.permute.xlu0 %574 }
  0xbb   :  { %v3328_v54 = vpop.permute.xlu1 %846 }
  0xbc   :  { %350 = vrot.lane.b32.xlu2 %v252_v34, %s2882_s6 }
  0xbf   :  { %v312_v38 = vpop.f32.mrf.mxu0 }
  0xc0   :  { %321 = vrot.lane.b32.xlu0 %v312_v38, %s2883_s7 }
  0xc1   :  { %338 = vrot.lane.b32.xlu1 %v292_v36, %s2884_s8 }
  0xc2   :  { %v3326_v53 = vpop.permute.xlu0 %780 }
  0xc4   :  { %1055 = vrot.lane.b32.xlu2 %v3221_v22, %s2885_s9 }
  0xc8   :  { %848 = vrot.lane.b32.xlu0 %v3221_v22, %s2880_s5  ;;  %s2906_s5 = smov 90  }
  0xc9   :  { %1053 = vrot.lane.b32.xlu1 %v3190_v14, %s2885_s9  ;;  %s2907_s9 = smov 26  }
  0xcc   :  { %1127 = vrot.lane.b32.xlu2 %v3190_v14, %s2886_s10 }
  0xd0   :  { %984 = vrot.lane.b32.xlu0 %v3221_v22, %s2887_s11 }
  0xd1   :  { %982 = vrot.lane.b32.xlu1 %v3190_v14, %s2887_s11  ;;  %s2911_s11 = smov 8  }
  0xd8   :  { %1200 = vrot.lane.b32.xlu0 %v3221_v22, %s2888_s12 }
  0xd9   :  { %1198 = vrot.lane.b32.xlu1 %v3190_v14, %s2888_s12  ;;  %s2912_s12 = smov 78  }
  0xf3   :  { %v347_v52 = vpop.permute.xlu2 %346 }
  0xfb   :  { %v345_v55 = vpop.permute.xlu2 %344 }
  0xfc   :  { %v355_v2 = vsel %vm352_vm3, %v345_v55, %v347_v52 }
 0x106   :  { %v349_v58 = vpop.permute.xlu2 %348 }
 0x107   :  { %v354_v13 = vsel %vm352_vm3, %v347_v52, %v349_v58 }
 0x10e   :  { %v3330_v63 = vpop.permute.xlu2 %916 }
 0x115   :  { %v316_v56 = vpop.permute.xlu0 %315 }
 0x116   :  { %v351_v9 = vpop.permute.xlu2 %350 }
 0x117   :  { %v353_v18 = vsel %vm352_vm3, %v349_v58, %v351_v9  ;;  %vm1137_vm3 = vcmask 842752  }
 0x11b   :  { %v335_v57 = vpop.permute.xlu1 %334 }
 0x11e   :  { %v3387_v34 = vpop.permute.xlu2 %1055 }
 0x122   :  { %v320_v60 = vpop.permute.xlu0 %319 }
 0x123   :  { %v333_v61 = vpop.permute.xlu1 %332 }
 0x124   :  { %v343_v0 = vsel %vm340_vm2, %v333_v61, %v335_v57 }
 0x125   :  { %v356_v5 = vmax.f32 %v343_v0, %v355_v2 }
 0x126   :  { %v3401_v35 = vpop.permute.xlu2 %1127 }
 0x12a   :  { %v318_v1 = vpop.permute.xlu0 %317 }
 0x12b   :  { %v327_v3 = vsel %vm325_vm4, %v318_v1, %v320_v60  ;;  %v337_v4 = vpop.permute.xlu1 %336 }
 0x12c   :  { %v329_v6 = vmax.f32 %v3275_v33, %v327_v3  ;;  %v342_v10 = vsel %vm340_vm2, %v335_v57, %v337_v4 }
 0x12d   :  { %v357_v19 = vmax.f32 %v342_v10, %v354_v13 }
 0x12e   :  { %v359_v7 = vmax.f32 %v329_v6, %v356_v5 }
 0x130   :  { %v366_v8 = vadd.f32 %v364_v42, %v359_v7 }
 0x132   :  { %v369_v11 = vmax.f32 %v366_v8, 0.0  ;;  %v322_v12 = vpop.permute.xlu0 %321 }
 0x133   :  { %v326_v15 = vsel %vm325_vm4, %v320_v60, %v322_v12  ;;  %v328_v16 = vsel %vm325_vm4, %v322_v12, %v316_v56  ;;  %v339_v17 = vpop.permute.xlu1 %338  ;;  %vm1350_vm4 = vcmask 818176  }
 0x134   :  { %372 = vst [vmem:[#allocation2] sm:$0x3f] %v369_v11  ;;  %v330_v20 = vmax.f32 %v3271_v31, %v326_v15  ;;  %v341_v21 = vsel %vm340_vm2, %v337_v4, %v339_v17  ;;  %v331_v23 = vmax.f32 %v3273_v32, %v328_v16  ;;  %v3498_v15 = vld [vmem:[%s4261_s1 + $0x18] sm:$0xff]  ;;  %vm1208_vm2 = vcmask 834560  }
 0x135   :  { %v358_v24 = vmax.f32 %v341_v21, %v353_v18 }
 0x136   :  { %v360_v25 = vmax.f32 %v330_v20, %v357_v19 }
 0x137   :  { %v361_v26 = vmax.f32 %v331_v23, %v358_v24 }
 0x138   :  { %v367_v27 = vadd.f32 %v364_v42, %v360_v25 }
 0x139   :  { %v368_v28 = vadd.f32 %v364_v42, %v361_v26 }
 0x13a   :  { %v370_v29 = vmax.f32 %v367_v27, 0.0  ;;  %v3405_v37 = vpop.permute.xlu0 %848 }
 0x13b   :  { %v371_v30 = vmax.f32 %v368_v28, 0.0  ;;  %v380_v33 = vld [vmem:[#allocation2] sm:$0x3f]  ;;  %v3403_v36 = vpop.permute.xlu1 %1053 }
 0x13c   :  { %373 = vst [vmem:[#allocation2 + $0x8] sm:$0x3f] %v370_v29  ;;  %390 = vrot.lane.b32.xlu1 %v380_v33, %s2889_s13  ;;  %2629 = vmatpush.msk.msra.mxu3 %vm401_vm5, %v380_v33  ;;  %v3353_v31 = vld [vmem:[#allocation2] sm:$0x3f] }
 0x13d   :  { %375 = vst.msk [vmem:[#allocation2 + $0x10] sm:$0x3f] %vm374_vm6, %v371_v30  ;;  %918 = vrot.lane.b32.xlu2 %v380_v33, %s2890_s15  ;;  %510 = vrot.lane.b32.xlu0 %v380_v33, %s2891_s16  ;;  %vm1279_vm6 = vcmask 826368  }
 0x13e   :  { %2630 = vmatmul.msk.f32.vlgmr.msra.gmra.mxu3 %vm396_vm7, %v3190_v14 }
 0x142   :  { %v3418_v55 = vpop.permute.xlu0 %984 }
 0x143   :  { %v3366_v32 = vld [vmem:[#allocation2 + $0x8] sm:$0x3f]  ;;  %v3416_v52 = vpop.permute.xlu1 %982 }
 0x144   :  { %646 = vrot.lane.b32.xlu1 %v380_v33, %s2892_s17  ;;  %v3407_v38 = vld [vmem:[#allocation2 + $0x10] sm:$0x3f]  ;;  %v3420_v56 = vld [vmem:[#allocation2 + $0x8] sm:$0x3f] }
 0x145   :  { %850 = vrot.lane.b32.xlu2 %v380_v33, %s2893_s18  ;;  %782 = vrot.lane.b32.xlu0 %v380_v33, %s2894_s19 }
 0x146   :  { %2631 = vmatmul.msk.f32.gmra.mxu3 %vm396_vm7, %v3221_v22 }
 0x14a   :  { %v3437_v59 = vpop.permute.xlu0 %1200 }
 0x14b   :  { %v3431_v58 = vpop.permute.xlu1 %1198 }
 0x14c   :  { %578 = vrot.lane.b32.xlu1 %v380_v33, %s2895_s20 }
 0x14d   :  { %986 = vrot.lane.b32.xlu2 %v380_v33, %s2896_s21  ;;  %714 = vrot.lane.b32.xlu0 %v380_v33, %s2876_s23 }
 0x154   :  { %1060 = vrot.lane.b32.xlu1 %v3353_v31, %s2875_s14 }
 0x155   :  { %1131 = vrot.lane.b32.xlu2 %v3353_v31, %s2897_s22  ;;  %1273 = vrot.lane.b32.xlu0 %v3353_v31, %s2898_s24 }
 0x15c   :  { %1202 = vrot.lane.b32.xlu1 %v3353_v31, %s2899_s25 }
 0x15d   :  { %1344 = vrot.lane.b32.xlu2 %v3353_v31, %s2900_s26  ;;  %1269 = vrot.lane.b32.xlu0 %v3190_v14, %s2901_s27 }
 0x164   :  { %392 = vrot.lane.b32.xlu1 %v3366_v32, %s2889_s13 }
 0x165   :  { %1340 = vrot.lane.b32.xlu2 %v3190_v14, %s2902_s28  ;;  %1486 = vrot.lane.b32.xlu0 %v3353_v31, %s2903_s29 }
 0x16c   :  { %1129 = vrot.lane.b32.xlu1 %v3221_v22, %s2886_s10  ;;  %s2909_s10 = smov 88  }
 0x16d   :  { %1482 = vrot.lane.b32.xlu0 %v3190_v14, %s2883_s7  ;;  %648 = vrot.lane.b32.xlu2 %v3366_v32, %s2892_s17 }
 0x174   :  { %512 = vrot.lane.b32.xlu1 %v3366_v32, %s2891_s16  ;;  %s2913_s16 = smov 79  }
 0x175   :  { %1413 = vrot.lane.b32.xlu0 %v3221_v22, %s2904_s30  ;;  %580 = vrot.lane.b32.xlu2 %v3366_v32, %s2895_s20 }
 0x17c   :  { %1342 = vrot.lane.b32.xlu1 %v3221_v22, %s2902_s28  ;;  %s2596_s28 = sshll.u32 %s4262_s2, 4  ;;  %s2597_s28 = int_to_ptr.hbm [resolvable:$true] %s2596_s28 }
 0x17d   :  { %1626 = vrot.lane.b32.xlu0 %v3221_v22, %s2905_s4  ;;  %1271 = vrot.lane.b32.xlu2 %v3221_v22, %s2901_s27 }
 0x184   :  { %1415 = vrot.lane.b32.xlu1 %v3353_v31, %s2881_s0 }
 0x185   :  { %920 = vrot.lane.b32.xlu0 %v3366_v32, %s2890_s15  ;;  %1484 = vrot.lane.b32.xlu2 %v3221_v22, %s2883_s7 }
 0x18c   :  { %784 = vrot.lane.b32.xlu1 %v3366_v32, %s2894_s19 }
 0x18d   :  { %852 = vrot.lane.b32.xlu0 %v3366_v32, %s2893_s18  ;;  %1557 = vrot.lane.b32.xlu2 %v3353_v31, %s2906_s5 }
 0x194   :  { %716 = vrot.lane.b32.xlu1 %v3366_v32, %s2876_s23  ;;  %s2908_s23 = smov 89  }
 0x195   :  { %1064 = vrot.lane.b32.xlu0 %v3407_v38, %s2875_s14  ;;  %1553 = vrot.lane.b32.xlu2 %v3190_v14, %s2907_s9 }
 0x197   :  { %v3414_v42 = vpop.permute.xlu2 %918 }
 0x19c   :  { %1411 = vrot.lane.b32.xlu1 %v3190_v14, %s2904_s30 }
 0x19d   :  { %988 = vrot.lane.b32.xlu0 %v3366_v32, %s2896_s21  ;;  %1062 = vrot.lane.b32.xlu2 %v3420_v56, %s2875_s14  ;;  %s2910_s14 = smov 14  }
 0x19f   :  { %v3427_v57 = vpop.permute.xlu2 %850 }
 0x1a4   :  { %1628 = vrot.lane.b32.xlu1 %v3353_v31, %s2908_s23 }
 0x1a5   :  { %1699 = vrot.lane.b32.xlu0 %v3353_v31, %s2909_s10  ;;  %1770 = vrot.lane.b32.xlu2 %v3353_v31, %s2878_s3 }
 0x1a7   :  { %v3439_v60 = vpop.permute.xlu2 %986 }
 0x1ac   :  { %1624 = vrot.lane.b32.xlu1 %v3190_v14, %s2905_s4 }
 0x1ad   :  { %1695 = vrot.lane.b32.xlu0 %v3190_v14, %s2910_s14  ;;  %1204 = vrot.lane.b32.xlu2 %v3420_v56, %s2899_s25 }
 0x1ae   :  { %v391_v61 = vpop.permute.xlu1 %390 }
 0x1af   :  { %v3446_v62 = vpop.permute.xlu2 %1131  ;;  %v3448_v0 = vpop.permute.xlu0 %510 }
 0x1b4   :  { %1555 = vrot.lane.b32.xlu1 %v3221_v22, %s2907_s9 }
 0x1b5   :  { %1206 = vrot.lane.b32.xlu0 %v3407_v38, %s2899_s25  ;;  %1766 = vrot.lane.b32.xlu2 %v3190_v14, %s2911_s11 }
 0x1b6   :  { %v3456_v1 = vpop.permute.xlu1 %646 }
 0x1b7   :  { %v3458_v2 = vpop.permute.xlu2 %1344  ;;  %v3460_v3 = vpop.permute.xlu0 %782 }
 0x1bc   :  { %1768 = vrot.lane.b32.xlu1 %v3221_v22, %s2911_s11 }
 0x1bd   :  { %1133 = vrot.lane.b32.xlu0 %v3420_v56, %s2897_s22  ;;  %1697 = vrot.lane.b32.xlu2 %v3221_v22, %s2910_s14 }
 0x1be   :  { %v579_v4 = vpop.permute.xlu1 %578 }
 0x1bf   :  { %v3468_v5 = vpop.permute.xlu2 %1340  ;;  %v3470_v6 = vpop.permute.xlu0 %714 }
 0x1c4   :  { %1135 = vrot.lane.b32.xlu1 %v3407_v38, %s2897_s22  ;;  %s2916_s22 = smov 77  }
 0x1c5   :  { %1346 = vrot.lane.b32.xlu0 %v3420_v56, %s2900_s26  ;;  %1277 = vrot.lane.b32.xlu2 %v3407_v38, %s2898_s24 }
 0x1c6   :  { %v3478_v7 = vpop.permute.xlu1 %1060 }
 0x1c7   :  { %v649_v8 = vpop.permute.xlu2 %648  ;;  %v3480_v9 = vpop.permute.xlu0 %1273 }
 0x1cc   :  { %1348 = vrot.lane.b32.xlu1 %v3407_v38, %s2900_s26 }
 0x1cd   :  { %1925 = vrot.lane.b32.xlu0 %v3353_v31, %s2912_s12  ;;  %1490 = vrot.lane.b32.xlu2 %v3407_v38, %s2903_s29 }
 0x1ce   :  { %v3488_v10 = vpop.permute.xlu1 %1202 }
 0x1cf   :  { %v581_v11 = vpop.permute.xlu2 %580  ;;  %v3490_v12 = vpop.permute.xlu0 %1269 }
 0x1d0   :  { %v583_v13 = vsel %vm582_vm8, %v579_v4, %v581_v11  ;;  %vm1421_vm8 = vcmask 752640  }
 0x1d1   :  { %2641 = vmatpush.msk.msrb.mxu0 %vm401_vm5, %v583_v13 }
 0x1d2   :  { %2642 = vmatmul.msk.f32.vlgmr.msrb.gmra.mxu0 %vm396_vm7, %v3322_v50 }
 0x1d4   :  { %1275 = vrot.lane.b32.xlu1 %v3420_v56, %s2898_s24  ;;  %s2919_s24 = smov [#allocation3]  }
 0x1d5   :  { %1921 = vrot.lane.b32.xlu0 %v3498_v15, %s2892_s17  ;;  %1417 = vrot.lane.b32.xlu2 %v3420_v56, %s2881_s0  ;;  %s2594_s25 = sshll.u32 %s2919_s24, 4  ;;  %s2595_s25 = int_to_ptr.vmem [resolvable:$true] %s2594_s25 }
 0x1d6   :  { %v393_v16 = vpop.permute.xlu1 %392 }
 0x1d7   :  { %v3506_v17 = vpop.permute.xlu2 %1271  ;;  %v395_v18 = vsel %vm394_vm9, %v391_v61, %v393_v16  ;;  %v3508_v19 = vpop.permute.xlu0 %1486  ;;  %2626 = vmatpush.msk.msra.mxu2 %vm401_vm5, %v393_v16  ;;  %vm1492_vm9 = vcmask 744448  }
 0x1d8   :  { %2623 = vmatpush.msk.msra.mxu1 %vm401_vm5, %v395_v18  ;;  %2627 = vmatmul.msk.f32.vlgmr.msra.gmra.mxu2 %vm396_vm7, %v3298_v39 }
 0x1d9   :  { %2624 = vmatmul.msk.f32.vlgmr.msra.gmra.mxu1 %vm396_vm7, %v3298_v39 }
 0x1da   :  { %2632 = vmatpush.msk.msrb.mxu1 %vm401_vm5, %v3366_v32  ;;  %2643 = vmatmul.msk.f32.gmra.mxu0 %vm396_vm7, %v3308_v43 }
 0x1dc   :  { %2644 = vmatpush.msk.msra.mxu1 %vm401_vm5, %v581_v11  ;;  %1854 = vrot.lane.b32.xlu1 %v3353_v31, %s2913_s16 }
 0x1dd   :  { %1419 = vrot.lane.b32.xlu0 %v3407_v38, %s2881_s0  ;;  %1630 = vrot.lane.b32.xlu2 %v3420_v56, %s2908_s23  ;;  %s2914_s0 = smov 2  }
 0x1de   :  { %v3527_v20 = vpop.permute.xlu1 %1129 }
 0x1df   :  { %v3529_v39 = vpop.permute.xlu2 %1484  ;;  %v3531_v21 = vpop.permute.xlu0 %1482 }
 0x1e0   :  { %2628 = vmatmul.msk.f32.gmra.mxu2 %vm396_vm7, %v3302_v40 }
 0x1e1   :  { %2625 = vmatmul.msk.f32.gmra.mxu1 %vm396_vm7, %v3302_v40  ;;  %v651_v40 = vsel %vm650_vm11, %v3456_v1, %v649_v8  ;;  %vm1563_vm11 = vcmask 736256  }
 0x1e4   :  { %1488 = vrot.lane.b32.xlu1 %v3420_v56, %s2903_s29 }
 0x1e5   :  { %1632 = vrot.lane.b32.xlu0 %v3407_v38, %s2908_s23  ;;  %1845 = vrot.lane.b32.xlu2 %v3498_v15, %s2914_s0 }
 0x1e6   :  { %v513_v23 = vpop.permute.xlu1 %512 }
 0x1e7   :  { %v3543_v24 = vpop.permute.xlu2 %1557  ;;  %v515_v25 = vsel %vm514_vm10, %v3448_v0, %v513_v23  ;;  %v3546_v26 = vpop.permute.xlu0 %1413  ;;  %2638 = vmatpush.msk.msrb.mxu3 %vm401_vm5, %v513_v23  ;;  %vm1634_vm10 = vcmask 728064  }
 0x1e8   :  { %2635 = vmatpush.msk.msrb.mxu2 %vm401_vm5, %v515_v25  ;;  %2639 = vmatmul.msk.f32.vlgmr.msrb.gmra.mxu3 %vm396_vm7, %v3306_v41 }
 0x1e9   :  { %2650 = vmatpush.msk.msra.mxu3 %vm401_vm5, %v649_v8  ;;  %2633 = vmatmul.msk.f32.vlgmr.msrb.gmra.mxu1 %vm396_vm7, %v3190_v14 }
 0x1ea   :  { %2636 = vmatmul.msk.f32.vlgmr.msrb.gmra.mxu2 %vm396_vm7, %v3306_v41 }
 0x1eb   :  { %2647 = vmatpush.msk.msra.mxu2 %vm401_vm5, %v651_v40 }
 0x1ec   :  { %1843 = vrot.lane.b32.xlu1 %v3190_v14, %s2914_s0 }
 0x1ed   :  { %1559 = vrot.lane.b32.xlu0 %v3420_v56, %s2906_s5  ;;  %1703 = vrot.lane.b32.xlu2 %v3407_v38, %s2909_s10 }
 0x1ee   :  { %v3565_v27 = vpop.permute.xlu1 %1342 }
 0x1ef   :  { %v3567_v28 = vpop.permute.xlu2 %1553  ;;  %v3569_v29 = vpop.permute.xlu0 %1626 }
 0x1f0   :  { %2640 = vmatmul.msk.f32.gmra.mxu3 %vm396_vm7, %v3310_v44 }
 0x1f1   :  { %2634 = vmatmul.msk.f32.gmra.mxu1 %vm396_vm7, %v3221_v22 }
 0x1f2   :  { %2637 = vmatmul.msk.f32.gmra.mxu2 %vm396_vm7, %v3310_v44 }
 0x1f4   :  { %1561 = vrot.lane.b32.xlu1 %v3407_v38, %s2906_s5 }
 0x1f5   :  { %1772 = vrot.lane.b32.xlu0 %v3420_v56, %s2878_s3  ;;  %1929 = vrot.lane.b32.xlu2 %v3407_v38, %s2912_s12 }
 0x1f6   :  { %v3583_v14 = vpop.permute.xlu1 %1415 }
 0x1f7   :  { %v921_v41 = vpop.permute.xlu0 %920  ;;  %v1063_v30 = vpop.permute.xlu2 %1062 }
 0x1f8   :  { %2651 = vmatmul.msk.f32.vlgmr.msra.gmra.mxu3 %vm396_vm7, %v3316_v47  ;;  %v1067_v1 = vsel %vm1066_vm15, %v3478_v7, %v1063_v30 }
 0x1f9   :  { %2645 = vmatmul.msk.f32.vlgmr.msra.gmra.mxu1 %vm396_vm7, %v3322_v50  ;;  %v3611_v50 = vld [vmem:[%s4261_s1 + $0x28] sm:$0x1] }
 0x1fa   :  { %2648 = vmatmul.msk.f32.vlgmr.msra.gmra.mxu2 %vm396_vm7, %v3316_v47  ;;  %v923_v47 = vsel %vm922_vm13, %v3414_v42, %v921_v41  ;;  %vm1705_vm13 = vcmask 719872  }
 0x1fc   :  { %1774 = vrot.lane.b32.xlu1 %v3407_v38, %s2878_s3 }
 0x1fd   :  { %1858 = vrot.lane.b32.xlu0 %v3407_v38, %s2913_s16  ;;  %1856 = vrot.lane.b32.xlu2 %v3420_v56, %s2913_s16 }
 0x1fe   :  { %v785_v22 = vpop.permute.xlu1 %784 }
 0x1ff   :  { %v787_v44 = vsel %vm786_vm12, %v3460_v3, %v785_v22  ;;  %v853_v33 = vpop.permute.xlu0 %852  ;;  %2662 = vmatpush.msk.msrb.mxu3 %vm401_vm5, %v785_v22  ;;  %v3613_v32 = vpop.permute.xlu2 %1770  ;;  %vm1776_vm12 = vcmask 654336  }
 0x200   :  { %2652 = vmatmul.msk.f32.gmra.mxu3 %vm396_vm7, %v3312_v45  ;;  %2659 = vmatpush.msk.msrb.mxu2 %vm401_vm5, %v787_v44  ;;  %v855_v0 = vsel %vm854_vm0, %v3427_v57, %v853_v33  ;;  %v3783_v44 = vpop.f32.mrf.mxu3  ;;  %vm1851_vm0 = vcmask 15360  }
 0x201   :  { %2674 = vmatpush.msk.msra.mxu3 %vm401_vm5, %v921_v41  ;;  %2646 = vmatmul.msk.f32.gmra.mxu1 %vm396_vm7, %v3308_v43 }
 0x202   :  { %2649 = vmatmul.msk.f32.gmra.mxu2 %vm396_vm7, %v3312_v45 }
 0x203   :  { %2671 = vmatpush.msk.msra.mxu2 %vm401_vm5, %v923_v47 }
 0x204   :  { %1701 = vrot.lane.b32.xlu1 %v3420_v56, %s2909_s10 }
 0x205   :  { %1923 = vrot.lane.b32.xlu0 %v3611_v50, %s2892_s17  ;;  %1849 = vrot.lane.b32.xlu2 %v3611_v50, %s2914_s0  ;;  %s2915_s17 = smov 76  }
 0x206   :  { %v717_v43 = vpop.permute.xlu1 %716 }
 0x207   :  { %v719_v45 = vsel %vm718_vm14, %v3470_v6, %v717_v43  ;;  %v1065_v42 = vpop.permute.xlu0 %1064  ;;  %2656 = vmatpush.msk.msrb.mxu1 %vm401_vm5, %v717_v43  ;;  %v1205_v3 = vpop.permute.xlu2 %1204  ;;  %vm1860_vm14 = vcmask 646144  }
 0x208   :  { %v1068_v61 = vsel %vm1066_vm15, %v1063_v30, %v1065_v42  ;;  %2653 = vmatpush.msk.msra.mxu0 %vm401_vm5, %v719_v45  ;;  %2663 = vmatmul.msk.f32.vlgmr.msrb.gmra.mxu3 %vm396_vm7, %v3314_v46  ;;  %v3805_v45 = vpop.f32.mrf.mxu3  ;;  %vm1931_vm15 = vcmask 637952  }
 0x209   :  { %2668 = vmatpush.msk.msra.mxu1 %vm401_vm5, %v853_v33  ;;  %2686 = vmatpush.msk.msrb.mxu3 %vm401_vm5, %v1068_v61 }
 0x20a   :  { %2654 = vmatmul.msk.f32.vlgmr.msra.gmra.mxu0 %vm396_vm7, %v3320_v49  ;;  %2657 = vmatmul.msk.f32.vlgmr.msrb.gmra.mxu1 %vm396_vm7, %v3320_v49 }
 0x20b   :  { %2660 = vmatmul.msk.f32.vlgmr.msrb.gmra.mxu2 %vm396_vm7, %v3314_v46  ;;  %2665 = vmatpush.msk.msrb.mxu0 %vm401_vm5, %v855_v0  ;;  %v1838_v46 = vld [vmem:[%s4261_s1 + $0x20] sm:$0x1] }
 0x20c   :  { %2683 = vmatpush.msk.msrb.mxu2 %vm401_vm5, %v1067_v1  ;;  %1927 = vrot.lane.b32.xlu1 %v3420_v56, %s2912_s12 }
 0x20d   :  { %2067 = vrot.lane.b32.xlu0 %v3353_v31, %s2915_s17  ;;  %2071 = vrot.lane.b32.xlu2 %v3407_v38, %s2915_s17 }
 0x20e   :  { %v3643_v49 = vpop.permute.xlu1 %1411 }
 0x20f   :  { %v989_v57 = vpop.permute.xlu0 %988  ;;  %v3665_v6 = vpop.permute.xlu2 %1766 }
 0x210   :  { %v991_v4 = vsel %vm990_vm1, %v3439_v60, %v989_v57  ;;  %2680 = vmatpush.msk.msrb.mxu1 %vm401_vm5, %v989_v57  ;;  %2664 = vmatmul.msk.f32.gmra.mxu3 %vm396_vm7, %v3326_v53  ;;  %vm2073_vm1 = vcmask 621568  }
 0x211   :  { %2677 = vmatpush.msk.msra.mxu0 %vm401_vm5, %v991_v4 }
 0x212   :  { %2655 = vmatmul.msk.f32.gmra.mxu0 %vm396_vm7, %v3318_v48  ;;  %2658 = vmatmul.msk.f32.gmra.mxu1 %vm396_vm7, %v3318_v48  ;;  %v1209_v48 = vsel %vm1208_vm2, %v3488_v10, %v1205_v3 }
 0x213   :  { %2661 = vmatmul.msk.f32.gmra.mxu2 %vm396_vm7, %v3326_v53 }
 0x214   :  { %1847 = vrot.lane.b32.xlu1 %v1838_v46, %s2914_s0 }
 0x215   :  { %2063 = vrot.lane.b32.xlu0 %v3498_v15, %s2896_s21  ;;  %1998 = vrot.lane.b32.xlu2 %v3420_v56, %s2916_s22 }
 0x216   :  { %v3663_v60 = vpop.permute.xlu1 %1628 }
 0x217   :  { %v3667_v7 = vpop.permute.xlu0 %1699 }
 0x218   :  { %2675 = vmatmul.msk.f32.vlgmr.msra.gmra.mxu3 %vm396_vm7, %v3324_v51 }
 0x21a   :  { %2666 = vmatmul.msk.f32.vlgmr.msrb.gmra.mxu0 %vm396_vm7, %v3328_v54  ;;  %2669 = vmatmul.msk.f32.vlgmr.msra.gmra.mxu1 %vm396_vm7, %v3328_v54  ;;  %v3690_v54 = vpop.permute.xlu2 %1697 }
 0x21b   :  { %2672 = vmatmul.msk.f32.vlgmr.msra.gmra.mxu2 %vm396_vm7, %v3324_v51 }
 0x21c   :  { %2695 = vmatpush.msk.msra.mxu2 %vm401_vm5, %v1209_v48  ;;  %2069 = vrot.lane.b32.xlu1 %v3420_v56, %s2915_s17 }
 0x21d   :  { %2000 = vrot.lane.b32.xlu0 %v3407_v38, %s2916_s22  ;;  %2065 = vrot.lane.b32.xlu2 %v3611_v50, %s2896_s21  ;;  %s2917_s21 = smov 118  }
 0x21e   :  { %v3684_v53 = vpop.permute.xlu1 %1624 }
 0x21f   :  { %v3686_v8 = vpop.permute.xlu0 %1695 }
 0x220   :  { %2676 = vmatmul.msk.f32.gmra.mxu3 %vm396_vm7, %v3330_v63 }
 0x222   :  { %2667 = vmatmul.msk.f32.gmra.mxu0 %vm396_vm7, %v3405_v37  ;;  %2670 = vmatmul.msk.f32.gmra.mxu1 %vm396_vm7, %v3405_v37 }
 0x223   :  { %2673 = vmatmul.msk.f32.gmra.mxu2 %vm396_vm7, %v3330_v63  ;;  %v1278_v63 = vpop.permute.xlu2 %1277 }
 0x224   :  { %1996 = vrot.lane.b32.xlu1 %v3353_v31, %s2916_s22 }
 0x225   :  { %1994 = vrot.lane.b32.xlu0 %v3611_v50, %s2917_s21 }
 0x226   :  { %v3700_v51 = vpop.permute.xlu1 %1555 }
 0x227   :  { %v1207_v38 = vpop.permute.xlu0 %1206 }
 0x228   :  { %v1210_v56 = vsel %vm1208_vm2, %v1205_v3, %v1207_v38  ;;  %2687 = vmatmul.msk.f32.vlgmr.msrb.gmra.mxu3 %vm396_vm7, %v3403_v36  ;;  %vm2002_vm2 = vcmask 629760  }
 0x229   :  { %2698 = vmatpush.msk.msra.mxu3 %vm401_vm5, %v1210_v56 }
 0x22a   :  { %2678 = vmatmul.msk.f32.vlgmr.msra.gmra.mxu0 %vm396_vm7, %v3416_v52  ;;  %2681 = vmatmul.msk.f32.vlgmr.msrb.gmra.mxu1 %vm396_vm7, %v3416_v52 }
 0x22b   :  { %2684 = vmatmul.msk.f32.vlgmr.msrb.gmra.mxu2 %vm396_vm7, %v3403_v36  ;;  %v1491_v36 = vpop.permute.xlu2 %1490 }
 0x22c   :  { %1992 = vrot.lane.b32.xlu1 %v3498_v15, %s2917_s21 }
 0x22e   :  { %v3713_v31 = vpop.permute.xlu1 %1768 }
 0x22f   :  { %v1134_v37 = vpop.permute.xlu0 %1133 }
 0x230   :  { %v1138_v10 = vsel %vm1137_vm3, %v3446_v62, %v1134_v37  ;;  %2688 = vmatmul.msk.f32.gmra.mxu3 %vm396_vm7, %v3387_v34 }
 0x231   :  { %2689 = vmatpush.msk.msrb.mxu0 %vm401_vm5, %v1138_v10 }
 0x232   :  { %2679 = vmatmul.msk.f32.gmra.mxu0 %vm396_vm7, %v3418_v55  ;;  %2682 = vmatmul.msk.f32.gmra.mxu1 %vm396_vm7, %v3418_v55 }
 0x233   :  { %2685 = vmatmul.msk.f32.gmra.mxu2 %vm396_vm7, %v3387_v34  ;;  %v1418_v55 = vpop.permute.xlu2 %1417 }
 0x234   :  { %v1422_v23 = vsel %vm1421_vm8, %v3583_v14, %v1418_v55 }
 0x236   :  { %v1136_v52 = vpop.permute.xlu1 %1135 }
 0x237   :  { %v1139_v11 = vsel %vm1137_vm3, %v1134_v37, %v1136_v52  ;;  %v1347_v13 = vpop.permute.xlu0 %1346  ;;  %vm2309_vm3 = vcmask 1040384  }
 0x238   :  { %v1351_v62 = vsel %vm1350_vm4, %v3458_v2, %v1347_v13  ;;  %2692 = vmatpush.msk.msra.mxu1 %vm401_vm5, %v1139_v11  ;;  %2699 = vmatmul.msk.f32.vlgmr.msra.gmra.mxu3 %vm396_vm7, %v3431_v58 }
 0x239   :  { %2707 = vmatpush.msk.msrb.mxu2 %vm401_vm5, %v1351_v62 }
 0x23a   :  { %2690 = vmatmul.msk.f32.vlgmr.msrb.gmra.mxu0 %vm396_vm7, %v3401_v35  ;;  %2693 = vmatmul.msk.f32.vlgmr.msra.gmra.mxu1 %vm396_vm7, %v3401_v35 }
 0x23b   :  { %2696 = vmatmul.msk.f32.vlgmr.msra.gmra.mxu2 %vm396_vm7, %v3431_v58  ;;  %v1631_v25 = vpop.permute.xlu2 %1630 }
 0x23c   :  { %v1635_v30 = vsel %vm1634_vm10, %v3663_v60, %v1631_v25 }
 0x23e   :  { %v1349_v34 = vpop.permute.xlu1 %1348 }
 0x23f   :  { %v1352_v15 = vsel %vm1350_vm4, %v1347_v13, %v1349_v34  ;;  %v3736_v2 = vpop.permute.xlu0 %1925  ;;  %vm2296_vm4 = vcmask 72704  }
 0x240   :  { %2700 = vmatmul.msk.f32.gmra.mxu3 %vm396_vm7, %v3437_v59 }
 0x241   :  { %2710 = vmatpush.msk.msrb.mxu3 %vm401_vm5, %v1352_v15 }
 0x242   :  { %2691 = vmatmul.msk.f32.gmra.mxu0 %vm396_vm7, %v3527_v20  ;;  %2694 = vmatmul.msk.f32.gmra.mxu1 %vm396_vm7, %v3527_v20 }
 0x243   :  { %2697 = vmatmul.msk.f32.gmra.mxu2 %vm396_vm7, %v3437_v59  ;;  %v3771_v40 = vpop.permute.xlu2 %1845 }
 0x246   :  { %v1276_v35 = vpop.permute.xlu1 %1275 }
 0x247   :  { %v1280_v58 = vsel %vm1279_vm6, %v3480_v9, %v1276_v35  ;;  %v1281_v16 = vsel %vm1279_vm6, %v1276_v35, %v1278_v63  ;;  %v3748_v18 = vpop.permute.xlu0 %1921  ;;  %vm2382_vm6 = vcmask 261120  }
 0x248   :  { %2701 = vmatpush.msk.msra.mxu0 %vm401_vm5, %v1280_v58  ;;  %2704 = vmatpush.msk.msrb.mxu1 %vm401_vm5, %v1281_v16 }
 0x249   :  { %2711 = vmatmul.msk.f32.vlgmr.msrb.gmra.mxu3 %vm396_vm7, %v3468_v5 }
 0x24a   :  { %2713 = vmatpush.msk.msrb.mxu0 %vm401_vm5, %v1422_v23  ;;  %2705 = vmatmul.msk.f32.vlgmr.msrb.gmra.mxu1 %vm396_vm7, %v3490_v12 }
 0x24b   :  { %2702 = vmatmul.msk.f32.vlgmr.msra.gmra.mxu0 %vm396_vm7, %v3490_v12  ;;  %2708 = vmatmul.msk.f32.vlgmr.msrb.gmra.mxu2 %vm396_vm7, %v3468_v5 }
 0x24e   :  { %v3763_v59 = vpop.permute.xlu1 %1854 }
 0x24f   :  { %v1420_v9 = vpop.permute.xlu0 %1419  ;;  %v3837_v60 = vpop.f32.mrf.mxu0 }
 0x250   :  { %v1423_v20 = vsel %vm1421_vm8, %v1418_v55, %v1420_v9  ;;  %vm2445_vm8 = vcmask 130048  }
 0x251   :  { %2712 = vmatmul.msk.f32.gmra.mxu3 %vm396_vm7, %v3565_v27  ;;  %2716 = vmatpush.msk.msra.mxu1 %vm401_vm5, %v1423_v20 }
 0x252   :  { %2706 = vmatmul.msk.f32.gmra.mxu1 %vm396_vm7, %v3506_v17 }
 0x253   :  { %2703 = vmatmul.msk.f32.gmra.mxu0 %vm396_vm7, %v3506_v17  ;;  %2709 = vmatmul.msk.f32.gmra.mxu2 %vm396_vm7, %v3565_v27  ;;  %v1704_v27 = vpop.permute.xlu2 %1703 }
 0x256   :  { %v3777_v5 = vpop.f32.mrf.mxu1  ;;  %v1489_v12 = vpop.permute.xlu1 %1488 }
 0x257   :  { %v1493_v14 = vsel %vm1492_vm9, %v3508_v19, %v1489_v12  ;;  %v1494_v41 = vsel %vm1492_vm9, %v1489_v12, %v1491_v36  ;;  %v1633_v22 = vpop.permute.xlu0 %1632  ;;  %v612_v13 = vpop.f32.mrf.mxu0  ;;  %vm2500_vm9 = vcmask 588800  }
 0x258   :  { %2719 = vmatpush.msk.msra.mxu2 %vm401_vm5, %v1493_v14  ;;  %2722 = vmatpush.msk.msra.mxu3 %vm401_vm5, %v1494_v41  ;;  %v1636_v17 = vsel %vm1634_vm10, %v1631_v25, %v1633_v22  ;;  %vm2532_vm10 = vcmask 392192  }
 0x259   :  { %2723 = vmatmul.msk.f32.vlgmr.msra.gmra.mxu3 %vm396_vm7, %v3531_v21 }
 0x25a   :  { %2731 = vmatpush.msk.msrb.mxu2 %vm401_vm5, %v1635_v30  ;;  %2734 = vmatpush.msk.msrb.mxu3 %vm401_vm5, %v1636_v17 }
 0x25b   :  { %2714 = vmatmul.msk.f32.vlgmr.msrb.gmra.mxu0 %vm396_vm7, %v3643_v49  ;;  %2717 = vmatmul.msk.f32.vlgmr.msra.gmra.mxu1 %vm396_vm7, %v3643_v49  ;;  %v3795_v19 = vpop.f32.mrf.mxu2  ;;  %v1930_v0 = vpop.permute.xlu2 %1929 }
 0x25c   :  { %2720 = vmatmul.msk.f32.vlgmr.msra.gmra.mxu2 %vm396_vm7, %v3531_v21 }
 0x25e   :  { %v3797_v33 = vpop.f32.mrf.mxu1  ;;  %v3799_v47 = vpop.permute.xlu1 %1843 }
 0x25f   :  { %v1560_v50 = vpop.permute.xlu0 %1559 }
 0x260   :  { %v1564_v43 = vsel %vm1563_vm11, %v3543_v24, %v1560_v50 }
 0x261   :  { %2724 = vmatmul.msk.f32.gmra.mxu3 %vm396_vm7, %v3529_v39  ;;  %2725 = vmatpush.msk.msra.mxu0 %vm401_vm5, %v1564_v43 }
 0x263   :  { %2715 = vmatmul.msk.f32.gmra.mxu0 %vm396_vm7, %v3546_v26  ;;  %2718 = vmatmul.msk.f32.gmra.mxu1 %vm396_vm7, %v3546_v26  ;;  %v3811_v21 = vpop.f32.mrf.mxu2  ;;  %v1857_v46 = vpop.permute.xlu2 %1856 }
 0x264   :  { %2721 = vmatmul.msk.f32.gmra.mxu2 %vm396_vm7, %v3529_v39  ;;  %v1861_v37 = vsel %vm1860_vm14, %v3763_v59, %v1857_v46 }
 0x266   :  { %v500_v42 = vpop.f32.mrf.mxu1  ;;  %v1562_v24 = vpop.permute.xlu1 %1561 }
 0x267   :  { %v1565_v61 = vsel %vm1563_vm11, %v1560_v50, %v1562_v24  ;;  %v1773_v1 = vpop.permute.xlu0 %1772  ;;  %v501_v55 = vadd.f32 %v500_v42, %v3795_v19  ;;  %vm2560_vm11 = vcmask 97280  }
 0x268   :  { %2728 = vmatpush.msk.msrb.mxu1 %vm401_vm5, %v1565_v61  ;;  %v1777_v3 = vsel %vm1776_vm12, %v3613_v32, %v1773_v1 }
 0x269   :  { %2735 = vmatmul.msk.f32.vlgmr.msrb.gmra.mxu3 %vm396_vm7, %v3684_v53  ;;  %2743 = vmatpush.msk.msra.mxu2 %vm401_vm5, %v1777_v3 }
 0x26b   :  { %2726 = vmatmul.msk.f32.vlgmr.msra.gmra.mxu0 %vm396_vm7, %v3567_v28  ;;  %2729 = vmatmul.msk.f32.vlgmr.msrb.gmra.mxu1 %vm396_vm7, %v3567_v28  ;;  %v564_v39 = vpop.f32.mrf.mxu3 }
 0x26c   :  { %2732 = vmatmul.msk.f32.vlgmr.msrb.gmra.mxu2 %vm396_vm7, %v3684_v53 }
 0x26d   :  { %v3826_v26 = vpop.f32.mrf.mxu2 }
 0x26e   :  { %v503_v49 = vpop.f32.mrf.mxu1  ;;  %v1775_v57 = vpop.permute.xlu1 %1774 }
 0x26f   :  { %v1778_v32 = vsel %vm1776_vm12, %v1773_v1, %v1775_v57  ;;  %v1859_v4 = vpop.permute.xlu0 %1858  ;;  %v504_v9 = vadd.f32 %v503_v49, %v3811_v21  ;;  %vm2587_vm12 = vcmask 17408  }
 0x270   :  { %2746 = vmatpush.msk.msra.mxu3 %vm401_vm5, %v1778_v32 }
 0x271   :  { %2736 = vmatmul.msk.f32.gmra.mxu3 %vm396_vm7, %v3569_v29 }
 0x273   :  { %2727 = vmatmul.msk.f32.gmra.mxu0 %vm396_vm7, %v3700_v51  ;;  %2730 = vmatmul.msk.f32.gmra.mxu1 %vm396_vm7, %v3700_v51  ;;  %v567_v28 = vpop.f32.mrf.mxu3  ;;  %v1862_v51 = vsel %vm1860_vm14, %v1857_v46, %v1859_v4 }
 0x274   :  { %2733 = vmatmul.msk.f32.gmra.mxu2 %vm396_vm7, %v3569_v29  ;;  %v573_v14 = vadd.f32 %v567_v28, %v504_v9 }
 0x275   :  { %v544_v48 = vpop.f32.mrf.mxu2 }
 0x276   :  { %v632_v53 = vpop.f32.mrf.mxu1  ;;  %v1702_v38 = vpop.permute.xlu1 %1701 }
 0x277   :  { %v1706_v56 = vsel %vm1705_vm13, %v3667_v7, %v1702_v38  ;;  %v1707_v63 = vsel %vm1705_vm13, %v1702_v38, %v1704_v27  ;;  %v3841_v10 = vpop.permute.xlu0 %1923  ;;  %v1850_v7 = vpop.permute.xlu2 %1849 }
 0x278   :  { %2737 = vmatpush.msk.msrb.mxu0 %vm401_vm5, %v1706_v56  ;;  %2740 = vmatpush.msk.msra.mxu1 %vm401_vm5, %v1707_v63 }
 0x279   :  { %2747 = vmatmul.msk.f32.vlgmr.msra.gmra.mxu3 %vm396_vm7, %v3665_v6 }
 0x27a   :  { %2749 = vmatpush.msk.msra.mxu0 %vm401_vm5, %v1861_v37  ;;  %2752 = vmatpush.msk.msrb.mxu1 %vm401_vm5, %v1862_v51 }
 0x27b   :  { %2738 = vmatmul.msk.f32.vlgmr.msrb.gmra.mxu0 %vm396_vm7, %v3686_v8  ;;  %2741 = vmatmul.msk.f32.vlgmr.msra.gmra.mxu1 %vm396_vm7, %v3686_v8  ;;  %v700_v29 = vpop.f32.mrf.mxu3 }
 0x27c   :  { %2744 = vmatmul.msk.f32.vlgmr.msra.gmra.mxu2 %vm396_vm7, %v3665_v6  ;;  %v571_v6 = vadd.f32 %v564_v39, %v501_v55 }
 0x27d   :  { %v3855_v36 = vpop.f32.mrf.mxu2 }
 0x27e   :  { %v635_v52 = vpop.f32.mrf.mxu1  ;;  %v1928_v11 = vpop.permute.xlu1 %1927 }
 0x27f   :  { %v1932_v62 = vsel %vm1931_vm15, %v3736_v2, %v1928_v11  ;;  %v1933_v34 = vsel %vm1931_vm15, %v1928_v11, %v1930_v0  ;;  %v2068_v15 = vpop.permute.xlu0 %2067  ;;  %v639_v2 = vadd.f32 %v632_v53, %v571_v6  ;;  %v2072_v58 = vpop.permute.xlu2 %2071  ;;  %v641_v30 = vadd.f32 %v635_v52, %v573_v14 }
 0x280   :  { %2755 = vmatpush.msk.msrb.mxu2 %vm401_vm5, %v1932_v62  ;;  %2758 = vmatpush.msk.msrb.mxu3 %vm401_vm5, %v1933_v34 }
 0x281   :  { %2748 = vmatmul.msk.f32.gmra.mxu3 %vm396_vm7, %v3713_v31  ;;  %v707_v16 = vadd.f32 %v700_v29, %v639_v2 }
 0x283   :  { %2739 = vmatmul.msk.f32.gmra.mxu0 %vm396_vm7, %v3690_v54  ;;  %2742 = vmatmul.msk.f32.gmra.mxu1 %vm396_vm7, %v3690_v54  ;;  %v703_v8 = vpop.f32.mrf.mxu3  ;;  %v1852_v54 = vsel %vm1851_vm0, %v3799_v47, %v3771_v40  ;;  %v478_v40 = vadd.f32 %v3783_v44, %v3777_v5 }
 0x284   :  { %2745 = vmatmul.msk.f32.gmra.mxu2 %vm396_vm7, %v3713_v31  ;;  %v481_v31 = vadd.f32 %v3805_v45, %v3797_v33  ;;  %v709_v17 = vadd.f32 %v703_v8, %v641_v30 }
 0x285   :  { %v680_v35 = vpop.f32.mrf.mxu2 }
 0x286   :  { %v1848_v23 = vpop.permute.xlu1 %1847  ;;  %v572_v22 = vadd.f32 %v544_v48, %v481_v31 }
 0x287   :  { %v768_v25 = vpop.f32.mrf.mxu1  ;;  %v745_v59 = vpop.f32.mrf.mxu0  ;;  %v1853_v5 = vsel %vm1851_vm0, %v1848_v23, %v1850_v7 }
 0x288   :  { %v775_v20 = vadd.f32 %v768_v25, %v707_v16  ;;  %v2064_v12 = vpop.permute.xlu0 %2063  ;;  %v1999_v45 = vpop.permute.xlu2 %1998  ;;  %v640_v24 = vadd.f32 %v612_v13, %v572_v22 }
 0x289   :  { %2759 = vmatmul.msk.f32.vlgmr.msrb.gmra.mxu3 %vm396_vm7, %v3748_v18 }
 0x28a   :  { %v708_v44 = vadd.f32 %v680_v35, %v640_v24 }
 0x28b   :  { %2750 = vmatmul.msk.f32.vlgmr.msra.gmra.mxu0 %vm396_vm7, %v1852_v54  ;;  %2753 = vmatmul.msk.f32.vlgmr.msrb.gmra.mxu1 %vm396_vm7, %v1852_v54  ;;  %v836_v41 = vpop.f32.mrf.mxu3 }
 0x28c   :  { %2756 = vmatmul.msk.f32.vlgmr.msrb.gmra.mxu2 %vm396_vm7, %v3748_v18  ;;  %v570_v18 = vadd.f32 %v3826_v26, %v478_v40  ;;  %v843_v26 = vadd.f32 %v836_v41, %v775_v20 }
 0x28e   :  { %v813_v19 = vpop.f32.mrf.mxu2  ;;  %v2070_v27 = vpop.permute.xlu1 %2069  ;;  %v638_v3 = vadd.f32 %v3837_v60, %v570_v18 }
 0x28f   :  { %v771_v47 = vpop.f32.mrf.mxu1  ;;  %v2074_v33 = vsel %vm2073_vm1, %v2068_v15, %v2070_v27  ;;  %v2075_v50 = vsel %vm2073_vm1, %v2070_v27, %v2072_v58  ;;  %v748_v43 = vpop.f32.mrf.mxu0 }
 0x290   :  { %v777_v21 = vadd.f32 %v771_v47, %v709_v17  ;;  %v2001_v42 = vpop.permute.xlu0 %2000  ;;  %2767 = vmatpush.msk.msra.mxu2 %vm401_vm5, %v2074_v33  ;;  %2770 = vmatpush.msk.msra.mxu3 %vm401_vm5, %v2075_v50  ;;  %v776_v39 = vadd.f32 %v748_v43, %v708_v44  ;;  %v706_v32 = vadd.f32 %v3855_v36, %v638_v3 }
 0x291   :  { %v2004_v61 = vsel %vm2002_vm2, %v1999_v45, %v2001_v42  ;;  %2760 = vmatmul.msk.f32.gmra.mxu3 %vm396_vm7, %v3841_v10 }
 0x292   :  { %2764 = vmatpush.msk.msra.mxu1 %vm401_vm5, %v2004_v61  ;;  %v774_v38 = vadd.f32 %v745_v59, %v706_v32 }
 0x293   :  { %2751 = vmatmul.msk.f32.gmra.mxu0 %vm396_vm7, %v1853_v5  ;;  %2754 = vmatmul.msk.f32.gmra.mxu1 %vm396_vm7, %v1853_v5  ;;  %v839_v0 = vpop.f32.mrf.mxu3 }
 0x294   :  { %2757 = vmatmul.msk.f32.gmra.mxu2 %vm396_vm7, %v3841_v10  ;;  %v845_v1 = vadd.f32 %v839_v0, %v777_v21  ;;  %v842_v56 = vadd.f32 %v813_v19, %v774_v38  ;;  %v2066_v10 = vpop.permute.xlu2 %2065  ;;  %v2149_v38 = vld [vmem:[%s4261_s1 + $0x120] sm:$0xff] }
 0x296   :  { %v816_v49 = vpop.f32.mrf.mxu2  ;;  %v1997_v57 = vpop.permute.xlu1 %1996 }
 0x297   :  { %v844_v4 = vadd.f32 %v816_v49, %v776_v39  ;;  %v2003_v46 = vsel %vm2002_vm2, %v1997_v57, %v1999_v45  ;;  %v881_v28 = vpop.f32.mrf.mxu0  ;;  %v904_v48 = vpop.f32.mrf.mxu1 }
 0x298   :  { %v911_v53 = vadd.f32 %v904_v48, %v843_v26  ;;  %2761 = vmatpush.msk.msrb.mxu0 %vm401_vm5, %v2003_v46  ;;  %v910_v37 = vadd.f32 %v881_v28, %v842_v56  ;;  %v1995_v55 = vpop.permute.xlu0 %1994  ;;  %vm2171_vm5 = vcmask 1043456  }
 0x299   :  { %2771 = vmatmul.msk.f32.vlgmr.msra.gmra.mxu3 %vm396_vm7, %v2064_v12 }
 0x29a   :  { %2175 = vmatpush.msra.mxu0 %v2149_v38 }
 0x29b   :  { %v972_v63 = vpop.f32.mrf.mxu3 }
 0x29c   :  { %2768 = vmatmul.msk.f32.vlgmr.msra.gmra.mxu2 %vm396_vm7, %v2064_v12  ;;  %v979_v60 = vadd.f32 %v972_v63, %v911_v53  ;;  %v2148_v63 = vld [vmem:[%s4261_s1 + $0x110] sm:$0xff] }
 0x29d   :  { %2176 = vmatpush.msra.mxu0 %v2148_v63 }
 0x29e   :  { %v949_v51 = vpop.f32.mrf.mxu2  ;;  %v1993_v29 = vpop.permute.xlu1 %1992 }
 0x29f   :  { %v978_v7 = vadd.f32 %v949_v51, %v910_v37  ;;  %v884_v36 = vpop.f32.mrf.mxu0  ;;  %v907_v52 = vpop.f32.mrf.mxu1  ;;  %2762 = vmatmul.msk.f32.vlgmr.msrb.gmra.mxu0 %vm396_vm7, %v1993_v29  ;;  %2765 = vmatmul.msk.f32.vlgmr.msra.gmra.mxu1 %vm396_vm7, %v1993_v29  ;;  %v2147_v51 = vld [vmem:[%s4261_s1 + $0x100] sm:$0xff] }
 0x2a0   :  { %v912_v11 = vadd.f32 %v884_v36, %v844_v4  ;;  %v913_v13 = vadd.f32 %v907_v52, %v845_v1  ;;  %v2163_v29 = vld [vmem:[%s4261_s1 + $0x200] sm:$0xf]  ;;  %2177 = vmatpush.msra.mxu0 %v2147_v51  ;;  %v2162_v36 = vld [vmem:[%s4261_s1 + $0x1f0] sm:$0xff] }
 0x2a1   :  { %2772 = vmatmul.msk.f32.gmra.mxu3 %vm396_vm7, %v2066_v10  ;;  %2773 = vmatpush.msk.msrb.mxu1 %vm2171_vm5, %v2163_v29  ;;  %v2145_v52 = vld [vmem:[%s4261_s1 + $0xe0] sm:$0xff] }
 0x2a3   :  { %v975_v62 = vpop.f32.mrf.mxu3  ;;  %2201 = vmatpush.msrb.mxu1 %v2162_v36 }
 0x2a4   :  { %v981_v34 = vadd.f32 %v975_v62, %v913_v13  ;;  %2769 = vmatmul.msk.f32.gmra.mxu2 %vm396_vm7, %v2066_v10  ;;  %v2144_v62 = vld [vmem:[%s4261_s1 + $0xd0] sm:$0xff] }
 0x2a6   :  { %v952_v15 = vpop.f32.mrf.mxu2 }
 0x2a7   :  { %v980_v6 = vadd.f32 %v952_v15, %v912_v11  ;;  %v1017_v8 = vpop.f32.mrf.mxu0  ;;  %v1040_v2 = vpop.f32.mrf.mxu1  ;;  %2763 = vmatmul.msk.f32.gmra.mxu0 %vm396_vm7, %v1995_v55  ;;  %2766 = vmatmul.msk.f32.gmra.mxu1 %vm396_vm7, %v1995_v55  ;;  %v2161_v11 = vld [vmem:[%s4261_s1 + $0x1e0] sm:$0xff]  ;;  %vm2164_vm7 = vcmask 883712  }
 0x2a8   :  { %v1046_v35 = vadd.f32 %v1017_v8, %v978_v7  ;;  %v1047_v58 = vadd.f32 %v1040_v2, %v979_v60  ;;  %v2146_v7 = vld [vmem:[%s4261_s1 + $0xf0] sm:$0xff]  ;;  %2202 = vmatpush.msrb.mxu1 %v2161_v11  ;;  %v2143_v8 = vld [vmem:[%s4261_s1 + $0xc0] sm:$0xff] }
 0x2a9   :  { %2178 = vmatpush.msra.mxu0 %v2146_v7  ;;  %v2159_v2 = vld [vmem:[%s4261_s1 + $0x1c0] sm:$0xff] }
 0x2ab   :  { %v1117_v16 = vpop.f32.mrf.mxu3  ;;  %2179 = vmatpush.msra.mxu0 %v2145_v52 }
 0x2ac   :  { %v1124_v23 = vadd.f32 %v1117_v16, %v1047_v58  ;;  %v2158_v58 = vld [vmem:[%s4261_s1 + $0x1b0] sm:$0xff]  ;;  %v2141_v16 = vld [vmem:[%s4261_s1 + $0xa0] sm:$0xff] }
 0x2ad   :  { %2180 = vmatpush.msra.mxu0 %v2144_v62 }
 0x2ae   :  { %v1094_v25 = vpop.f32.mrf.mxu2 }
 0x2af   :  { %v1123_v59 = vadd.f32 %v1094_v25, %v1046_v35  ;;  %v1020_v9 = vpop.f32.mrf.mxu0  ;;  %v1043_v20 = vpop.f32.mrf.mxu1  ;;  %2181 = vmatpush.msra.mxu0 %v2143_v8  ;;  %v2142_v35 = vld [vmem:[%s4261_s1 + $0xb0] sm:$0xff] }
 0x2b0   :  { %v1048_v12 = vadd.f32 %v1020_v9, %v980_v6  ;;  %v1049_v54 = vadd.f32 %v1043_v20, %v981_v34  ;;  %v2160_v34 = vld [vmem:[%s4261_s1 + $0x1d0] sm:$0xff] }
 0x2b1   :  { %2203 = vmatpush.msrb.mxu1 %v2160_v34  ;;  %2182 = vmatpush.msra.mxu0 %v2142_v35  ;;  %v2156_v9 = vld [vmem:[%s4261_s1 + $0x190] sm:$0xff] }
 0x2b3   :  { %v1120_v14 = vpop.f32.mrf.mxu3  ;;  %2204 = vmatpush.msrb.mxu1 %v2159_v2  ;;  %2183 = vmatpush.msra.mxu0 %v2141_v16 }
 0x2b4   :  { %v1126_v31 = vadd.f32 %v1120_v14, %v1049_v54  ;;  %v2139_v14 = vld [vmem:[%s4261_s1 + $0x80] sm:$0xff] }
 0x2b5   :  { %2205 = vmatpush.msrb.mxu1 %v2158_v58 }
 0x2b6   :  { %v1097_v41 = vpop.f32.mrf.mxu2 }
 0x2b7   :  { %v1125_v30 = vadd.f32 %v1097_v41, %v1048_v12  ;;  %v1165_v22 = vpop.f32.mrf.mxu0  ;;  %v1188_v17 = vpop.f32.mrf.mxu1  ;;  %v2138_v41 = vld [vmem:[%s4261_s1 + $0x70] sm:$0xff] }
 0x2b8   :  { %v1194_v19 = vadd.f32 %v1165_v22, %v1123_v59  ;;  %v1195_v27 = vadd.f32 %v1188_v17, %v1124_v23  ;;  %v2157_v23 = vld [vmem:[%s4261_s1 + $0x1a0] sm:$0xff]  ;;  %v2140_v59 = vld [vmem:[%s4261_s1 + $0x90] sm:$0xff] }
 0x2b9   :  { %2206 = vmatpush.msrb.mxu1 %v2157_v23  ;;  %2184 = vmatpush.msra.mxu0 %v2140_v59  ;;  %v2137_v22 = vld [vmem:[%s4261_s1 + $0x60] sm:$0xff] }
 0x2ba   :  { %v2153_v17 = vld [vmem:[%s4261_s1 + $0x160] sm:$0xff] }
 0x2bb   :  { %v1259_v40 = vpop.f32.mrf.mxu3  ;;  %2207 = vmatpush.msrb.mxu1 %v2156_v9  ;;  %2185 = vmatpush.msra.mxu0 %v2139_v14 }
 0x2bc   :  { %v3907_v47 = vadd.f32 %v1259_v40, %v1195_v27  ;;  %v2136_v27 = vld [vmem:[%s4261_s1 + $0x50] sm:$0xff] }
 0x2bd   :  { %2186 = vmatpush.msra.mxu0 %v2138_v41  ;;  %v2152_v40 = vld [vmem:[%s4261_s1 + $0x150] sm:$0xff] }
 0x2be   :  { %v1236_v33 = vpop.f32.mrf.mxu2 }
 0x2bf   :  { %v3909_v50 = vadd.f32 %v1236_v33, %v1194_v19  ;;  %v1168_v43 = vpop.f32.mrf.mxu0  ;;  %v1191_v45 = vpop.f32.mrf.mxu1  ;;  %2187 = vmatpush.msra.mxu0 %v2137_v22 }
 0x2c0   :  { %v1196_v21 = vadd.f32 %v1168_v43, %v1125_v30  ;;  %v1197_v42 = vadd.f32 %v1191_v45, %v1126_v31  ;;  %v2155_v31 = vld [vmem:[%s4261_s1 + $0x180] sm:$0xff]  ;;  %v2154_v30 = vld [vmem:[%s4261_s1 + $0x170] sm:$0xff] }
 0x2c1   :  { %2208 = vmatpush.msrb.mxu1 %v2155_v31  ;;  %2188 = vmatpush.msra.mxu0 %v2136_v27 }
 0x2c3   :  { %v1262_v18 = vpop.f32.mrf.mxu3  ;;  %2209 = vmatpush.msrb.mxu1 %v2154_v30 }
 0x2c4   :  { %v3911_v24 = vadd.f32 %v1262_v18, %v1197_v42  ;;  %v2151_v42 = vld [vmem:[%s4261_s1 + $0x140] sm:$0xff]  ;;  %v2134_v18 = vld [vmem:[%s4261_s1 + $0x30] sm:$0xff] }
 0x2c5   :  { %2210 = vmatpush.msrb.mxu1 %v2153_v17 }
 0x2c6   :  { %v1239_v61 = vpop.f32.mrf.mxu2 }
 0x2c7   :  { %v3913_v5 = vadd.f32 %v1239_v61, %v1196_v21  ;;  %v3917_v0 = vpop.f32.mrf.mxu1  ;;  %2211 = vmatpush.msrb.mxu1 %v2152_v40  ;;  %v2135_v21 = vld [vmem:[%s4261_s1 + $0x40] sm:$0xff]  ;;  %v2150_v61 = vld [vmem:[%s4261_s1 + $0x130] sm:$0xff] }
 0x2c8   :  { %v3915_v44 = vpop.f32.mrf.mxu0  ;;  %2189 = vmatpush.msra.mxu0 %v2135_v21  ;;  %v1337_v29 = vadd.f32 %v3917_v0, %v3907_v47 }
 0x2c9   :  { %2212 = vmatpush.msrb.mxu1 %v2151_v42  ;;  %v1336_v51 = vadd.f32 %v3915_v44, %v3909_v50 }
 0x2ca   :  { %2190 = vmatpush.msra.mxu0 %v2134_v18 }
 0x2cb   :  { %2213 = vmatpush.msrb.mxu1 %v2150_v61 }
 0x2cc   :  { %v3919_v1 = vpop.f32.mrf.mxu3 }
 0x2cd   :  { %v1408_v52 = vadd.f32 %v3919_v1, %v1337_v29 }
 0x2ce   :  { %v3921_v3 = vpop.f32.mrf.mxu2 }
 0x2cf   :  { %v3925_v26 = vpop.f32.mrf.mxu1  ;;  %v1407_v11 = vadd.f32 %v3921_v3, %v1336_v51 }
 0x2d0   :  { %v3923_v39 = vpop.f32.mrf.mxu0  ;;  %v1339_v47 = vadd.f32 %v3925_v26, %v3911_v24 }
 0x2d1   :  { %v1338_v50 = vadd.f32 %v3923_v39, %v3913_v5 }
 0x2d4   :  { %v3927_v49 = vpop.f32.mrf.mxu3 }
 0x2d5   :  { %v1410_v1 = vadd.f32 %v3927_v49, %v1339_v47 }
 0x2d6   :  { %v3929_v57 = vpop.f32.mrf.mxu2 }
 0x2d7   :  { %v1409_v3 = vadd.f32 %v3929_v57, %v1338_v50 }
 0x2d8   :  { %v3931_v32 = vpop.f32.mrf.mxu0  ;;  %v3933_v4 = vpop.f32.mrf.mxu1 }
 0x2d9   :  { %v1478_v34 = vadd.f32 %v3931_v32, %v1407_v11  ;;  %v1479_v8 = vadd.f32 %v3933_v4, %v1408_v52 }
 0x2dc   :  { %v3935_v46 = vpop.f32.mrf.mxu3 }
 0x2dd   :  { %v1550_v35 = vadd.f32 %v3935_v46, %v1479_v8  ;;  %v2846_v8 = vld [vmem:[%s4261_s1 + $0x18] sm:$0xff] }
 0x2df   :  { %v3937_v28 = vpop.f32.mrf.mxu2 }
 0x2e0   :  { %v3939_v48 = vpop.f32.mrf.mxu0  ;;  %v3941_v53 = vpop.f32.mrf.mxu1  ;;  %v1549_v2 = vadd.f32 %v3937_v28, %v1478_v34  ;;  %v2845_v34 = vld [vmem:[%s4261_s1 + $0x28] sm:$0x1] }
 0x2e1   :  { %v1480_v5 = vadd.f32 %v3939_v48, %v1409_v3  ;;  %v1481_v39 = vadd.f32 %v3941_v53, %v1410_v1 }
 0x2e4   :  { %v3946_v56 = vpop.f32.mrf.mxu3 }
 0x2e7   :  { %v3951_v60 = vpop.f32.mrf.mxu2 }
 0x2e8   :  { %v3953_v37 = vpop.f32.mrf.mxu0  ;;  %v3955_v10 = vpop.f32.mrf.mxu1 }
 0x2e9   :  { %v1620_v44 = vadd.f32 %v3953_v37, %v1549_v2  ;;  %v1621_v0 = vadd.f32 %v3955_v10, %v1550_v35  ;;  %v1551_v37 = vadd.f32 %v3951_v60, %v1480_v5  ;;  %v1552_v10 = vadd.f32 %v3946_v56, %v1481_v39  ;;  %v2253_v2 = vld [vmem:[%s4261_s1 + $0x220] sm:$0x1]  ;;  %v2251_v35 = vld [vmem:[%s4261_s1 + $0x210] sm:$0xff] }
 0x2ea   :  { %2776 = vmatpush.msk.msrb.mxu2 %vm2309_vm3, %v2253_v2 }
 0x2ec   :  { %v3976_v13 = vpop.f32.mrf.mxu3  ;;  %2331 = vmatpush.msrb.mxu2 %v2251_v35  ;;  %v2427_v35 = vld [vmem:[%s4261_s1 + $0x290] sm:$0xff] }
 0x2ed   :  { %v1692_v4 = vadd.f32 %v3976_v13, %v1621_v0 }
 0x2ef   :  { %v3984_v55 = vpop.f32.mrf.mxu2 }
 0x2f0   :  { %v3986_v15 = vpop.f32.mrf.mxu0  ;;  %v3988_v6 = vpop.f32.mrf.mxu1  ;;  %v1691_v32 = vadd.f32 %v3984_v55, %v1620_v44 }
 0x2f1   :  { %v1622_v55 = vadd.f32 %v3986_v15, %v1551_v37  ;;  %v1623_v13 = vadd.f32 %v3988_v6, %v1552_v10 }
 0x2f4   :  { %v4008_v25 = vpop.f32.mrf.mxu3 }
 0x2f5   :  { %v1694_v48 = vadd.f32 %v4008_v25, %v1623_v13 }
 0x2f7   :  { %v4016_v20 = vpop.f32.mrf.mxu2 }
 0x2f8   :  { %v1733_v12 = vpop.f32.mrf.mxu0  ;;  %v1756_v54 = vpop.f32.mrf.mxu1  ;;  %v1693_v14 = vadd.f32 %v4016_v20, %v1622_v55 }
 0x2f9   :  { %v1762_v24 = vadd.f32 %v1733_v12, %v1691_v32  ;;  %v1763_v26 = vadd.f32 %v1756_v54, %v1692_v4 }
 0x2fc   :  { %v1827_v19 = vpop.f32.mrf.mxu3 }
 0x2fd   :  { %v1834_v23 = vadd.f32 %v1827_v19, %v1763_v26 }
 0x2ff   :  { %v1804_v33 = vpop.f32.mrf.mxu2 }
 0x300   :  { %v1736_v43 = vpop.f32.mrf.mxu0  ;;  %v1759_v45 = vpop.f32.mrf.mxu1  ;;  %v1833_v49 = vadd.f32 %v1804_v33, %v1762_v24 }
 0x301   :  { %v1764_v60 = vadd.f32 %v1736_v43, %v1693_v14  ;;  %v1765_v41 = vadd.f32 %v1759_v45, %v1694_v48 }
 0x304   :  { %v1830_v38 = vpop.f32.mrf.mxu3 }
 0x305   :  { %v1836_v15 = vadd.f32 %v1830_v38, %v1765_v41  ;;  %v2918_v38 = vmov 22   ;;  %v2443_v41 = vld [vmem:[%s4261_s1 + $0x390] sm:$0xff] }
 0x306   :  { %2842 = vset.pattern.permute.xlu1 %v2918_v38  ;;  %2843 = vset.pattern.permute.xlu2 %v2918_v38 }
 0x307   :  { %v1807_v63 = vpop.f32.mrf.mxu2  ;;  %2483 = vmatpush.msra.mxu1 %v2443_v41  ;;  %v2531_v41 = vld [vmem:[%s4261_s1 + $0x4b0] ss:$0 sm:$0xff] }
 0x308   :  { %v1888_v7 = vpop.f32.mrf.mxu0  ;;  %v1911_v36 = vpop.f32.mrf.mxu1  ;;  %v1835_v17 = vadd.f32 %v1807_v63, %v1764_v60  ;;  %v2438_v60 = vld [vmem:[%s4261_s1 + $0x340] sm:$0xff] }
 0x309   :  { %v1917_v59 = vadd.f32 %v1888_v7, %v1833_v49  ;;  %v1918_v9 = vadd.f32 %v1911_v36, %v1834_v23  ;;  %v2254_v49 = vld [vmem:[%s4261_s1 + $0x228] sm:$0x1]  ;;  %v2252_v23 = vld [vmem:[%s4261_s1 + $0x218] sm:$0xff] }
 0x30a   :  { %2781 = vmatpush.msk.msrb.mxu3 %vm2309_vm3, %v2254_v49 }
 0x30c   :  { %v1982_v62 = vpop.f32.mrf.mxu3  ;;  %2360 = vmatpush.msrb.mxu3 %v2252_v23 }
 0x30d   :  { %v1989_v12 = vadd.f32 %v1982_v62, %v1918_v9 }
 0x30f   :  { %v1959_v58 = vpop.f32.mrf.mxu2 }
 0x310   :  { %v1891_v46 = vpop.f32.mrf.mxu0  ;;  %v1914_v28 = vpop.f32.mrf.mxu1  ;;  %v1988_v53 = vadd.f32 %v1959_v58, %v1917_v59 }
 0x311   :  { %v1919_v40 = vadd.f32 %v1891_v46, %v1835_v17  ;;  %v1920_v33 = vadd.f32 %v1914_v28, %v1836_v15  ;;  %v2436_v17 = vld [vmem:[%s4261_s1 + $0x320] sm:$0xff]  ;;  %v2435_v15 = vld [vmem:[%s4261_s1 + $0x310] sm:$0xff] }
 0x314   :  { %v1985_v16 = vpop.f32.mrf.mxu3 }
 0x315   :  { %v1991_v20 = vadd.f32 %v1985_v16, %v1920_v33 }
 0x317   :  { %v1962_v57 = vpop.f32.mrf.mxu2 }
 0x318   :  { %v1990_v25 = vadd.f32 %v1962_v57, %v1919_v40 }
 0x31c   :  { %v2030_v54 = vpop.f32.mrf.mxu0  ;;  %v2053_v31 = vpop.f32.mrf.mxu1 }
 0x31d   :  { %v2059_v56 = vadd.f32 %v2030_v54, %v1988_v53  ;;  %v2060_v30 = vadd.f32 %v2053_v31, %v1989_v12  ;;  %v2124_v22 = vpop.f32.mrf.mxu3  ;;  %v2441_v12 = vld [vmem:[%s4261_s1 + $0x370] sm:$0xff]  ;;  %v2440_v54 = vld [vmem:[%s4261_s1 + $0x360] sm:$0xff] }
 0x31e   :  { %2449 = vmatpush.msra.mxu2 %v2441_v12  ;;  %v2439_v31 = vld [vmem:[%s4261_s1 + $0x350] sm:$0xff] }
 0x31f   :  { %v2101_v19 = vpop.f32.mrf.mxu2  ;;  %v2131_v6 = vadd.f32 %v2124_v22, %v2060_v30  ;;  %v2437_v30 = vld [vmem:[%s4261_s1 + $0x330] sm:$0xff] }
 0x320   :  { %v2130_v27 = vadd.f32 %v2101_v19, %v2059_v56  ;;  %2450 = vmatpush.msra.mxu2 %v2440_v54  ;;  %v2261_v19 = vld [vmem:[%s4261_s1 + $0x260] sm:$0xff] }
 0x321   :  { %2774 = vmatmul.msk.f32.vlgmr.msrb.gmra.mxu1 %vm2164_vm7, %v2131_v6  ;;  %v2434_v6 = vld [vmem:[%s4261_s1 + $0x300] sm:$0xff] }
 0x322   :  { %2191 = vmatmul.f32.vlgmr.msra.gmra.mxu0 %v2130_v27  ;;  %2451 = vmatpush.msra.mxu2 %v2439_v31  ;;  %v2259_v27 = vld [vmem:[%s4261_s1 + $0x250] sm:$0xff] }
 0x324   :  { %v2033_v21 = vpop.f32.mrf.mxu0  ;;  %v2056_v42 = vpop.f32.mrf.mxu1  ;;  %2452 = vmatpush.msra.mxu2 %v2438_v60  ;;  %v2557_v60 = vld [vmem:[%s4261_s1 + $0x4c0] sm:$0xff] }
 0x325   :  { %v2061_v43 = vadd.f32 %v2033_v21, %v1990_v25  ;;  %v2062_v45 = vadd.f32 %v2056_v42, %v1991_v20  ;;  %v2127_v18 = vpop.f32.mrf.mxu3  ;;  %v2433_v25 = vld [vmem:[%s4261_s1 + $0x2f0] sm:$0xff]  ;;  %v2257_v20 = vld [vmem:[%s4261_s1 + $0x240] sm:$0xff] }
 0x326   :  { %2453 = vmatpush.msra.mxu2 %v2437_v30  ;;  %v2432_v42 = vld [vmem:[%s4261_s1 + $0x2e0] sm:$0xff] }
 0x327   :  { %v2104_v61 = vpop.f32.mrf.mxu2  ;;  %v2133_v51 = vadd.f32 %v2127_v18, %v2062_v45  ;;  %v2262_v18 = vld [vmem:[%s4261_s1 + $0x268] sm:$0xff] }
 0x328   :  { %v2132_v29 = vadd.f32 %v2104_v61, %v2061_v43  ;;  %2454 = vmatpush.msra.mxu2 %v2436_v17  ;;  %v2255_v43 = vld [vmem:[%s4261_s1 + $0x230] sm:$0xff] }
 0x329   :  { %2775 = vmatmul.msk.f32.gmra.mxu1 %vm2164_vm7, %v2133_v51  ;;  %v2431_v51 = vld [vmem:[%s4261_s1 + $0x2d0] sm:$0xff] }
 0x32a   :  { %2194 = vmatmul.f32.gmra.mxu0 %v2132_v29  ;;  %2455 = vmatpush.msra.mxu2 %v2435_v15  ;;  %v2559_v17 = vld [vmem:[%s4261_s1 + $0x4d4] ss:$0 sm:$0xff] }
 0x32c   :  { %2456 = vmatpush.msra.mxu2 %v2434_v6 }
 0x32e   :  { %2457 = vmatpush.msra.mxu2 %v2433_v25 }
 0x330   :  { %2458 = vmatpush.msra.mxu2 %v2432_v42 }
 0x332   :  { %2459 = vmatpush.msra.mxu2 %v2431_v51 }
 0x39e   :  { %v2215_v63 = vpop.f32.mrf.mxu1 }
 0x39f   :  { %v2192_v7 = vpop.f32.mrf.mxu0 }
 0x3a0   :  { %v2216_v36 = vadd.f32 %v2215_v63, %v2192_v7  ;;  %v2430_v63 = vld [vmem:[%s4261_s1 + $0x2c0] sm:$0xff] }
 0x3a1   :  { %2460 = vmatpush.msra.mxu2 %v2430_v63 }
 0x3a2   :  { %2231 = vrot.lane.b32.xlu0 %v2216_v36, %s2882_s6  ;;  %2227 = vrot.lane.b32.xlu2 %v2216_v36, %s2884_s8 }
 0x3a3   :  { %2221 = vrot.lane.b32.xlu1 %v2216_v36, %s2883_s7 }
 0x3a6   :  { %v2218_v52 = vpop.f32.mrf.mxu1 }
 0x3a7   :  { %v2195_v11 = vpop.f32.mrf.mxu0 }
 0x3a8   :  { %v2219_v62 = vadd.f32 %v2218_v52, %v2195_v11  ;;  %v2258_v52 = vld [vmem:[%s4261_s1 + $0x248] sm:$0xff]  ;;  %v2429_v11 = vld [vmem:[%s4261_s1 + $0x2b0] sm:$0xff] }
 0x3a9   :  { %2461 = vmatpush.msra.mxu2 %v2429_v11 }
 0x3aa   :  { %2233 = vrot.lane.b32.xlu0 %v2219_v62, %s2882_s6  ;;  %2229 = vrot.lane.b32.xlu2 %v2219_v62, %s2884_s8 }
 0x3ab   :  { %2223 = vrot.lane.b32.xlu1 %v2219_v62, %s2883_s7 }
 0x3b2   :  { %2244 = vperm.xlu2 %2843, %v2845_v34   ;;  %v2256_v34 = vld [vmem:[%s4261_s1 + $0x238] sm:$0xff] }
 0x3b3   :  { %2240 = vperm.xlu1 %2842, %v2846_v8   ;;  %v2428_v8 = vld [vmem:[%s4261_s1 + $0x2a0] sm:$0xff] }
 0x3b4   :  { %2462 = vmatpush.msra.mxu2 %v2428_v8 }
 0x3b6   :  { %2463 = vmatpush.msra.mxu2 %v2427_v35 }
 0x3fc   :  { %v2228_v50 = vpop.permute.xlu2 %2227 }
 0x404   :  { %v2230_v3 = vpop.permute.xlu2 %2229 }
 0x40c   :  { %v2245_v26 = vpop.permute.xlu2 %2244 }
 0x414   :  { %v2232_v47 = vpop.permute.xlu0 %2231 }
 0x415   :  { %v2222_v58 = vpop.permute.xlu1 %2221  ;;  %v2235_v0 = vmax.f32 %v2228_v50, %v2232_v47  ;;  %v2426_v50 = vld [vmem:[%s4261_s1 + $0x280] sm:$0xff] }
 0x416   :  { %v2225_v1 = vmax.f32 %v2216_v36, %v2222_v58  ;;  %v2263_v36 = vld [vmem:[%s4261_s1 + $0x270] sm:$0x3]  ;;  %2464 = vmatpush.msra.mxu2 %v2426_v50  ;;  %v2442_v47 = vld [vmem:[%s4261_s1 + $0x380] sm:$0xff] }
 0x417   :  { %2484 = vmatpush.msra.mxu1 %v2442_v47 }
 0x418   :  { %v2237_v28 = vmax.f32 %v2225_v1, %v2235_v0  ;;  %v2497_v0 = vld [vmem:[%s4261_s1 + $0x420] sm:$0xff]  ;;  %v2496_v1 = vld [vmem:[%s4261_s1 + $0x410] sm:$0xff] }
 0x41c   :  { %v2234_v32 = vpop.permute.xlu0 %2233 }
 0x41d   :  { %v2224_v44 = vpop.permute.xlu1 %2223  ;;  %v2236_v4 = vmax.f32 %v2230_v3, %v2234_v32  ;;  %v2495_v3 = vld [vmem:[%s4261_s1 + $0x400] sm:$0xff]  ;;  %v2494_v32 = vld [vmem:[%s4261_s1 + $0x3f0] sm:$0xff] }
 0x41e   :  { %v2226_v46 = vmax.f32 %v2219_v62, %v2224_v44  ;;  %v2498_v44 = vld [vmem:[%s4261_s1 + $0x430] sm:$0xff] }
 0x41f   :  { %2511 = vmatpush.msra.mxu3 %v2498_v44 }
 0x420   :  { %v2238_v39 = vmax.f32 %v2226_v46, %v2236_v4  ;;  %v2493_v4 = vld [vmem:[%s4261_s1 + $0x3e0] sm:$0xff]  ;;  %v2492_v46 = vld [vmem:[%s4261_s1 + $0x3d0] sm:$0xff] }
 0x421   :  { %2512 = vmatpush.msra.mxu3 %v2497_v0 }
 0x422   :  { %v2248_v37 = vadd.f32 %v2245_v26, %v2238_v39  ;;  %v2490_v39 = vld [vmem:[%s4261_s1 + $0x3b0] sm:$0xff] }
 0x423   :  { %2513 = vmatpush.msra.mxu3 %v2496_v1  ;;  %v2529_v26 = vld [vmem:[%s4261_s1 + $0x490] sm:$0xff] }
 0x424   :  { %v2250_v10 = vmax.f32 %v2248_v37, 0.0  ;;  %v2528_v37 = vld [vmem:[%s4261_s1 + $0x480] sm:$0xff] }
 0x425   :  { %v2241_v16 = vpop.permute.xlu1 %2240  ;;  %2514 = vmatpush.msra.mxu3 %v2495_v3 }
 0x426   :  { %v2247_v5 = vadd.f32 %v2241_v16, %v2237_v28 }
 0x427   :  { %2515 = vmatpush.msra.mxu3 %v2494_v32 }
 0x428   :  { %v2249_v24 = vmax.f32 %v2247_v5, 0.0  ;;  %v2491_v5 = vld [vmem:[%s4261_s1 + $0x3c0] sm:$0xff] }
 0x429   :  { %2516 = vmatpush.msra.mxu3 %v2493_v4 }
 0x42a   :  { %2264 = vxpose.xlu0.b32.start [1/2] (short) (narrow) %v2249_v24, 32  ;;  %v2530_v24 = vld [vmem:[%s4261_s1 + $0x4a0] sm:$0xff] }
 0x42b   :  { %2517 = vmatpush.msra.mxu3 %v2492_v46 }
 0x42d   :  { %2518 = vmatpush.msra.mxu3 %v2491_v5 }
 0x42f   :  { %2519 = vmatpush.msra.mxu3 %v2490_v39 }
 0x432   :  { %2265 = vxpose.xlu0.b32.end [2/2] (short) (narrow) %v2250_v10, 32  ;;  %v2444_v10 = vld [vmem:[%s4261_s1 + $0x3a0] ss:$0 sm:$0xff] }
 0x499   :  { %2844 = vset.pattern.permute.xlu0 %v2918_v38  ;;  %v2260_v38 = vld [vmem:[%s4261_s1 + $0x258] sm:$0xff] }
 0x4ce   :  { %v2280_v57 = vpop.trf.xlu0 }
 0x4cf   :  { %2777 = vmatmul.msk.f32.vlgmr.msrb.gmra.mxu2 %vm2296_vm4, %v2280_v57  ;;  %2782 = vmatmul.msk.f32.vlgmr.msrb.gmra.mxu3 %vm2296_vm4, %v2280_v57 }
 0x4d6   :  { %v2281_v55 = vpop.trf.xlu0 }
 0x4d7   :  { %2778 = vmatmul.msk.f32.gmra.mxu2 %vm2296_vm4, %v2281_v55  ;;  %2783 = vmatmul.msk.f32.gmra.mxu3 %vm2296_vm4, %v2281_v55 }
 0x4de   :  { %v2282_v13 = vpop.trf.xlu0 }
 0x4df   :  { %2779 = vmatmul.msk.f32.gmra.mxu2 %vm2296_vm4, %v2282_v13  ;;  %2784 = vmatmul.msk.f32.gmra.mxu3 %vm2296_vm4, %v2282_v13 }
 0x4e6   :  { %v2283_v59 = vpop.trf.xlu0 }
 0x4e7   :  { %2780 = vmatmul.msk.f32.gmra.mxu2 %vm2296_vm4, %v2283_v59  ;;  %2785 = vmatmul.msk.f32.gmra.mxu3 %vm2296_vm4, %v2283_v59  ;;  %v2527_v59 = vld [vmem:[%s4261_s1 + $0x470] sm:$0xff] }
 0x552   :  { %v2333_v9 = vpop.f32.mrf.mxu2  ;;  %v2362_v14 = vpop.f32.mrf.mxu3 }
 0x553   :  { %v2374_v29 = vmul.f32 %v2333_v9, %v2255_v43  ;;  %v2375_v58 = vmul.f32 %v2362_v14, %v2256_v34  ;;  %v2526_v9 = vld [vmem:[%s4261_s1 + $0x460] sm:$0xff]  ;;  %v2525_v14 = vld [vmem:[%s4261_s1 + $0x450] sm:$0xff] }
 0x55a   :  { %v2336_v48 = vpop.f32.mrf.mxu2  ;;  %v2365_v53 = vpop.f32.mrf.mxu3 }
 0x55b   :  { %v2376_v45 = vmul.f32 %v2336_v48, %v2257_v20  ;;  %v2377_v2 = vmul.f32 %v2365_v53, %v2258_v52  ;;  %v2558_v48 = vld [vmem:[%s4261_s1 + $0x4d0] sm:$0xf]  ;;  %v2499_v53 = vld [vmem:[%s4261_s1 + $0x440] ss:$0 sm:$0xff] }
 0x55c   :  { %2791 = vmatpush.msk.msrb.mxu1 %vm2171_vm5, %v2558_v48 }
 0x55e   :  { %2582 = vmatpush.msrb.mxu1 %v2557_v60 }
 0x562   :  { %v2339_v56 = vpop.f32.mrf.mxu2  ;;  %v2368_v22 = vpop.f32.mrf.mxu3 }
 0x563   :  { %v2378_v21 = vmul.f32 %v2339_v56, %v2259_v27  ;;  %v2379_v62 = vmul.f32 %v2368_v22, %v2260_v38 }
 0x56a   :  { %v2342_v40 = vpop.f32.mrf.mxu2  ;;  %v2371_v61 = vpop.f32.mrf.mxu3 }
 0x56b   :  { %v2380_v33 = vmul.f32 %v2342_v40, %v2261_v19  ;;  %v2381_v7 = vmul.f32 %v2371_v61, %v2262_v18 }
 0x56d   :  { %2398 = vmatpush.msrb.mxu0 %v2380_v33 }
 0x56f   :  { %2399 = vmatpush.msrb.mxu0 %v2378_v21 }
 0x571   :  { %2400 = vmatpush.msrb.mxu0 %v2376_v45 }
 0x573   :  { %2401 = vmatpush.msrb.mxu0 %v2374_v29 }
 0x574   :  { %2786 = vmatmul.msk.f32.vlgmr.msrb.gmra.mxu0 %vm2382_vm6, %v2263_v36 }
 0x575   :  { %2418 = vmatpush.msra.mxu0 %v2381_v7 }
 0x577   :  { %2419 = vmatpush.msra.mxu0 %v2379_v62 }
 0x579   :  { %2420 = vmatpush.msra.mxu0 %v2377_v2 }
 0x57b   :  { %2421 = vmatpush.msra.mxu0 %v2375_v58 }
 0x57c   :  { %2787 = vmatmul.msk.f32.vlgmr.msra.gmra.mxu0 %vm2382_vm6, %v2263_v36 }
 0x57d   :  { %2546 = vmatpush.msrb.mxu0 %v2530_v24 }
 0x57f   :  { %2547 = vmatpush.msrb.mxu0 %v2529_v26 }
 0x581   :  { %2548 = vmatpush.msrb.mxu0 %v2528_v37 }
 0x583   :  { %2549 = vmatpush.msrb.mxu0 %v2527_v59 }
 0x585   :  { %2550 = vmatpush.msrb.mxu0 %v2526_v9 }
 0x587   :  { %2551 = vmatpush.msrb.mxu0 %v2525_v14 }
 0x5f1   :  { %v2403_v28 = vpop.f32.mrf.mxu0 }
 0x5f2   :  { %2465 = vmatmul.f32.vlgmr.msra.gmra.mxu2 %v2403_v28 }
 0x5f9   :  { %v2423_v16 = vpop.f32.mrf.mxu0 }
 0x5fa   :  { %2788 = vmatmul.msk.f32.vlgmr.msra.gmra.mxu1 %vm2445_vm8, %v2423_v16 }
 0x675   :  { %v2466_v49 = vpop.f32.mrf.mxu2 }
 0x676   :  { %v2467_v23 = vadd.f32 %v2466_v49, %v2444_v10 }
 0x677   :  { %v2486_v57 = vpop.f32.mrf.mxu1 }
 0x678   :  { %v2487_v55 = vadd.f32 %v2486_v57, %v2467_v23 }
 0x67a   :  { %v2489_v13 = vmax.f32 %v2487_v55, 0.0 }
 0x67c   :  { %2789 = vmatmul.msk.f32.vlgmr.msra.gmra.mxu3 %vm2500_vm9, %v2489_v13 }
 0x6ff   :  { %v2521_v12 = vpop.f32.mrf.mxu3 }
 0x700   :  { %v2522_v54 = vadd.f32 %v2521_v12, %v2499_v53 }
 0x702   :  { %v2524_v31 = vmax.f32 %v2522_v54, 0.0 }
 0x704   :  { %2790 = vmatmul.msk.f32.vlgmr.msrb.gmra.mxu0 %vm2532_vm10, %v2524_v31 }
 0x781   :  { %v2553_v56 = vpop.f32.mrf.mxu0 }
 0x782   :  { %v2554_v30 = vadd.f32 %v2553_v56, %v2531_v41 }
 0x784   :  { %v2556_v22 = vmax.f32 %v2554_v30, 0.0 }
 0x786   :  { %2792 = vmatmul.msk.f32.vlgmr.msrb.gmra.mxu1 %vm2560_vm11, %v2556_v22 }
 0x803   :  { %v2584_v15 = vpop.f32.mrf.mxu1 }
 0x804   :  { %v2585_v19 = vadd.f32 %v2584_v15, %v2559_v17 }
 0x806   :  { %2588 = vst.msk [vmem:[#allocation3] sm:$0x3] %vm2587_vm12, %v2585_v19 }
 0x807   :  { %2599 = dma.vmem_to_hbm [thread:$0]  %s2595_s25, 32, %s2597_s28, [#allocation4]  }
 0x808   :  { %2871 = dma.done.wait [#allocation4], 32  }
 0x809   :  { %2872 = vsyncadd [#allocation4], 4294967264 }
 0x80a   :  { %2604 = vsyncpa [#allocation4], 1 }

</bundles_post_ra>
